<compile_context>
chip_gen: v7x
topology: tpu7x:2x2x1
jax: 0.10.0
libtpu: 0.0.40
codegen_flags: <defaults>
</compile_context>

<pallas_src>
import jax
import jax.numpy as jnp
from jax.experimental import pallas as pl
from jax.experimental.pallas import tpu as pltpu

K = 7                       # conv kernel size
HALF = (K - 1) // 2         # "same" padding = 3
PADH = 8                    # sublane-aligned origin of the row-padded map inside scratch


def _zpool_conv_gate(z_max, z_mean, pmax_ref, pmean_ref, t_ref, bias):
    """2-channel (max, mean) 7x7 same-conv as 14 accumulating MXU matmuls + BN + sigmoid.

    t_ref holds 14 stacked (ws, ws) banded Toeplitz blocks (BN scale folded in), one per
    (channel, kh) tap-row; the kh (sublane) shifts come from slicing the row-padded map.
    """
    hs, ws = z_max.shape
    zero_halo = jnp.zeros((HALF, ws), jnp.float32)
    for p, z in ((pmax_ref, z_max), (pmean_ref, z_mean)):
        p[PADH - HALF:PADH, :] = zero_halo                 # top halo rows (kh < 3)
        p[PADH + hs:PADH + hs + HALF, :] = zero_halo       # bottom halo rows (kh > 3)
        p[PADH:PADH + hs, :] = z                           # interior fully overwritten

    acc = jnp.zeros((hs, ws), jnp.float32)
    for c, p in enumerate((pmax_ref, pmean_ref)):
        for kh in range(K):
            r0 = PADH + kh - HALF                          # 5 .. 11
            blk = (c * K + kh) * ws
            acc = acc + jnp.dot(p[r0:r0 + hs, :], t_ref[blk:blk + ws, :],
                                preferred_element_type=jnp.float32)
    return jax.nn.sigmoid(acc + bias)


def triplet_attention_kernel(bias_ref, x_ref, t_hw_ref, t_cw_ref, t_hc_ref, o_ref,
                             hw_max, hw_mean, cw_max, cw_mean, hc_max, hc_mean):
    x = x_ref[0].astype(jnp.float32)                       # (C, H, W)

    # hw gate: ZPool over channels, conv over (H, W)
    w_hw = _zpool_conv_gate(jnp.max(x, axis=0), jnp.mean(x, axis=0),
                            hw_max, hw_mean, t_hw_ref, bias_ref[0])
    # cw gate: ZPool over H (PyTorch permute (0,2,1,3)), conv over (C, W)
    w_cw = _zpool_conv_gate(jnp.max(x, axis=1), jnp.mean(x, axis=1),
                            cw_max, cw_mean, t_cw_ref, bias_ref[1])
    # hc gate: ZPool over W (PyTorch permute (0,3,2,1)); computed spatially transposed
    # over (C, H) with a spatially-transposed (host-built) conv kernel.
    w_hc = _zpool_conv_gate(jnp.max(x, axis=2), jnp.mean(x, axis=2),
                            hc_max, hc_mean, t_hc_ref, bias_ref[2])

    total = w_hw[None, :, :] + w_cw[:, None, :] + w_hc[:, :, None]
    o_ref[0] = (x * total * (1.0 / 3.0)).astype(o_ref.dtype)


def triplet_attention(x, t_hw, t_cw, t_hc, biases):
    B, C, H, W = x.shape

    # Explicit VMEM budget (double-buffered I/O blocks + Toeplitz weights + scratch +
    # in-kernel temporaries), clamped to stay >= default scoped limit and < v5e/v6e cap.
    x_block = C * H * W * 4
    t_total = 4 * int(t_hw.size + t_cw.size + t_hc.size)
    scratch = 4 * 2 * ((H + 2 * PADH) * W + (C + 2 * PADH) * W + (C + 2 * PADH) * H)
    work = 8 * x_block
    vmem_limit = int(min(max(4 * x_block + 2 * t_total + scratch + work + (4 << 20),
                             32 << 20), 96 << 20))

    grid_spec = pltpu.PrefetchScalarGridSpec(
        num_scalar_prefetch=1,                             # 3 folded-BN biases -> SMEM
        grid=(B,),
        in_specs=[
            pl.BlockSpec((1, C, H, W), lambda b, bias: (b, 0, 0, 0)),
            pl.BlockSpec(t_hw.shape, lambda b, bias: (0, 0)),   # constant across grid
            pl.BlockSpec(t_cw.shape, lambda b, bias: (0, 0)),
            pl.BlockSpec(t_hc.shape, lambda b, bias: (0, 0)),
        ],
        out_specs=pl.BlockSpec((1, C, H, W), lambda b, bias: (b, 0, 0, 0)),
        scratch_shapes=[
            pltpu.VMEM((H + 2 * PADH, W), jnp.float32),    # hw max  (row-padded only)
            pltpu.VMEM((H + 2 * PADH, W), jnp.float32),    # hw mean
            pltpu.VMEM((C + 2 * PADH, W), jnp.float32),    # cw max
            pltpu.VMEM((C + 2 * PADH, W), jnp.float32),    # cw mean
            pltpu.VMEM((C + 2 * PADH, H), jnp.float32),    # hc max
            pltpu.VMEM((C + 2 * PADH, H), jnp.float32),    # hc mean
        ],
    )
    return pl.pallas_call(
        triplet_attention_kernel,
        out_shape=jax.ShapeDtypeStruct((B, C, H, W), x.dtype),
        grid_spec=grid_spec,
        compiler_params=pltpu.CompilerParams(
            dimension_semantics=("parallel",),
            vmem_limit_bytes=vmem_limit),
    )(biases, x, t_hw, t_cw, t_hc)


# ---------------- parameter construction (deterministic, in-script) ----------------

def make_gate_params(key):
    kconv, kg, kb = jax.random.split(key, 3)
    conv_w = 0.2 * jax.random.normal(kconv, (1, 2, K, K), jnp.float32)  # (O=1, I=2, 7, 7)
    gamma = 1.0 + 0.1 * jax.random.normal(kg, (), jnp.float32)
    beta = 0.1 * jax.random.normal(kb, (), jnp.float32)
    running_mean = jnp.zeros((), jnp.float32)     # eval-mode BN stats
    running_var = jnp.ones((), jnp.float32)
    eps = 1e-5
    scale = gamma / jnp.sqrt(running_var + eps)
    bias = beta - running_mean * scale
    return conv_w, scale, bias


def build_toeplitz(conv_w, scale, ws, transpose_spatial=False):
    """Stack of 14 banded (ws, ws) Toeplitz blocks, one per (channel, kh) conv tap row.

    out[h, w] = sum_{c,kh,j} z_c[h+kh-3, j] * T[(c*7+kh)*ws + j, w], with BN scale folded.
    """
    w = conv_w[0]                                  # (2, K, K)
    if transpose_spatial:                          # hc gate is computed transposed in-kernel
        w = jnp.transpose(w, (0, 2, 1))
    j = jnp.arange(ws)[:, None]
    col = jnp.arange(ws)[None, :]
    d = j - col + HALF                             # kw tap index
    mask = (d >= 0) & (d < K)
    dcl = jnp.clip(d, 0, K - 1)
    blocks = []
    for c in range(2):                             # 0 = max channel, 1 = mean channel
        for kh in range(K):
            taps = w[c, kh]                        # (K,) lane-direction weights
            blocks.append(jnp.where(mask, taps[dcl], 0.0))
    return (scale * jnp.concatenate(blocks, axis=0)).astype(jnp.float32)   # (14*ws, ws)


# ---------------- pure-JAX reference (mirrors the PyTorch forward) ----------------

def _gate_ref(x, conv_w, scale, bias):
    zmax = jnp.max(x, axis=1, keepdims=True)
    zmean = jnp.mean(x, axis=1, keepdims=True)
    z = jnp.concatenate([zmax, zmean], axis=1)                 # (B, 2, Hs, Ws)
    conv = jax.lax.conv_general_dilated(
        z, conv_w, window_strides=(1, 1),
        padding=((HALF, HALF), (HALF, HALF)),
        dimension_numbers=('NCHW', 'OIHW', 'NCHW'))
    att = jax.nn.sigmoid(conv * scale + bias)
    return x * att


def triplet_ref(x, cw_p, hc_p, hw_p):
    xp1 = jnp.transpose(x, (0, 2, 1, 3))
    o11 = jnp.transpose(_gate_ref(xp1, *cw_p), (0, 2, 1, 3))
    xp2 = jnp.transpose(x, (0, 3, 2, 1))
    o21 = jnp.transpose(_gate_ref(xp2, *hc_p), (0, 3, 2, 1))
    o = _gate_ref(x, *hw_p)
    return (1.0 / 3.0) * (o + o11 + o21)


if __name__ == "__main__":
    key = jax.random.PRNGKey(0)
    kx, khw, kcw, khc = jax.random.split(key, 4)

    B, C, H, W = 2, 4, 16, 16
    x = jax.random.normal(kx, (B, C, H, W), jnp.float32)

    hw_p = make_gate_params(khw)
    cw_p = make_gate_params(kcw)
    hc_p = make_gate_params(khc)

    t_hw = build_toeplitz(hw_p[0], hw_p[1], W)                          # (14*W, W)
    t_cw = build_toeplitz(cw_p[0], cw_p[1], W)                          # (14*W, W)
    t_hc = build_toeplitz(hc_p[0], hc_p[1], H, transpose_spatial=True)  # (14*H, H)
    biases = jnp.stack([hw_p[2], cw_p[2], hc_p[2]]).astype(jnp.float32)

    out = jax.block_until_ready(triplet_attention(x, t_hw, t_cw, t_hc, biases))
    ref = jax.block_until_ready(triplet_ref(x, cw_p, hc_p, hw_p))

    assert out.shape == x.shape and out.dtype == x.dtype
    if not bool(jnp.allclose(out, ref, atol=5e-5, rtol=5e-4)):
        raise AssertionError("Pallas TripletAttention mismatch vs JAX reference")
    print("KERNEL_OK")
</pallas_src>

<mosaic_0001>
module attributes {stable_mosaic.version = 11 : i64} {
  func.func @triplet_attention_kernel(%arg0: i32, %arg1: memref<3xf32, #tpu.memory_space<smem>>, %arg2: memref<1x4x16x16xf32, #tpu.memory_space<vmem>>, %arg3: memref<224x16xf32, #tpu.memory_space<vmem>>, %arg4: memref<224x16xf32, #tpu.memory_space<vmem>>, %arg5: memref<224x16xf32, #tpu.memory_space<vmem>>, %arg6: memref<1x4x16x16xf32, #tpu.memory_space<vmem>>, %arg7: memref<32x16xf32, #tpu.memory_space<vmem>>, %arg8: memref<32x16xf32, #tpu.memory_space<vmem>>, %arg9: memref<20x16xf32, #tpu.memory_space<vmem>>, %arg10: memref<20x16xf32, #tpu.memory_space<vmem>>, %arg11: memref<20x16xf32, #tpu.memory_space<vmem>>, %arg12: memref<20x16xf32, #tpu.memory_space<vmem>>) attributes {dimension_semantics = [#tpu.dimension_semantics<parallel>], iteration_bounds = array<i64: 2>, scalar_prefetch = 1 : i64, scratch_operands = 6 : i64, tpu.core_type = #tpu.core_type<tc>, window_params = [{transform_indices = @transform_0, window_bounds = array<i64: 1, 4, 16, 16>}, {pipeline_mode = #tpu.pipeline_mode<synchronous>, transform_indices = @transform_1, window_bounds = array<i64: 224, 16>}, {pipeline_mode = #tpu.pipeline_mode<synchronous>, transform_indices = @transform_2, window_bounds = array<i64: 224, 16>}, {pipeline_mode = #tpu.pipeline_mode<synchronous>, transform_indices = @transform_3, window_bounds = array<i64: 224, 16>}, {transform_indices = @transform_4, window_bounds = array<i64: 1, 4, 16, 16>}]} {
    %c0 = arith.constant 0 : index
    %c0_0 = arith.constant 0 : index
    %c0_1 = arith.constant 0 : index
    %c0_2 = arith.constant 0 : index
    %0 = vector.load %arg2[%c0, %c0_0, %c0_1, %c0_2] : memref<1x4x16x16xf32, #tpu.memory_space<vmem>>, vector<1x4x16x16xf32>
    %1 = vector.shape_cast %0 : vector<1x4x16x16xf32> to vector<4x16x16xf32>
    %cst = arith.constant dense<0xFF800000> : vector<16x16xf32>
    %2 = vector.multi_reduction <maximumf>, %1, %cst [0] : vector<4x16x16xf32> to vector<16x16xf32>
    %cst_3 = arith.constant dense<0.000000e+00> : vector<16x16xf32>
    %3 = vector.multi_reduction <add>, %1, %cst_3 [0] : vector<4x16x16xf32> to vector<16x16xf32>
    %cst_4 = arith.constant 4.000000e+00 : f32
    %4 = vector.broadcast %cst_4 : f32 to vector<16x16xf32>
    %5 = arith.divf %3, %4 : vector<16x16xf32>
    %c0_5 = arith.constant 0 : index
    %6 = memref.load %arg1[%c0_5] : memref<3xf32, #tpu.memory_space<smem>>
    %cst_6 = arith.constant 0.000000e+00 : f32
    %7 = vector.broadcast %cst_6 : f32 to vector<3x16xf32>
    %c5 = arith.constant 5 : index
    %c0_7 = arith.constant 0 : index
    %8 = vector.load %arg7[%c5, %c0_7] : memref<32x16xf32, #tpu.memory_space<vmem>>, vector<3x16xf32>
    tpu.vector_store %arg7[%c5, %c0_7], %7 {strides = array<i32>} : memref<32x16xf32, #tpu.memory_space<vmem>>, vector<3x16xf32>,
    %c24 = arith.constant 24 : index
    %c0_8 = arith.constant 0 : index
    %9 = vector.load %arg7[%c24, %c0_8] : memref<32x16xf32, #tpu.memory_space<vmem>>, vector<3x16xf32>
    tpu.vector_store %arg7[%c24, %c0_8], %7 {strides = array<i32>} : memref<32x16xf32, #tpu.memory_space<vmem>>, vector<3x16xf32>,
    %c8 = arith.constant 8 : index
    %c0_9 = arith.constant 0 : index
    %10 = vector.load %arg7[%c8, %c0_9] : memref<32x16xf32, #tpu.memory_space<vmem>>, vector<16x16xf32>
    tpu.vector_store %arg7[%c8, %c0_9], %2 {strides = array<i32>} : memref<32x16xf32, #tpu.memory_space<vmem>>, vector<16x16xf32>,
    %c5_10 = arith.constant 5 : index
    %c0_11 = arith.constant 0 : index
    %11 = vector.load %arg8[%c5_10, %c0_11] : memref<32x16xf32, #tpu.memory_space<vmem>>, vector<3x16xf32>
    tpu.vector_store %arg8[%c5_10, %c0_11], %7 {strides = array<i32>} : memref<32x16xf32, #tpu.memory_space<vmem>>, vector<3x16xf32>,
    %c24_12 = arith.constant 24 : index
    %c0_13 = arith.constant 0 : index
    %12 = vector.load %arg8[%c24_12, %c0_13] : memref<32x16xf32, #tpu.memory_space<vmem>>, vector<3x16xf32>
    tpu.vector_store %arg8[%c24_12, %c0_13], %7 {strides = array<i32>} : memref<32x16xf32, #tpu.memory_space<vmem>>, vector<3x16xf32>,
    %c8_14 = arith.constant 8 : index
    %c0_15 = arith.constant 0 : index
    %13 = vector.load %arg8[%c8_14, %c0_15] : memref<32x16xf32, #tpu.memory_space<vmem>>, vector<16x16xf32>
    tpu.vector_store %arg8[%c8_14, %c0_15], %5 {strides = array<i32>} : memref<32x16xf32, #tpu.memory_space<vmem>>, vector<16x16xf32>,
    %cst_16 = arith.constant 0.000000e+00 : f32
    %14 = vector.broadcast %cst_16 : f32 to vector<16x16xf32>
    %c5_17 = arith.constant 5 : index
    %c0_18 = arith.constant 0 : index
    %15 = vector.load %arg7[%c5_17, %c0_18] : memref<32x16xf32, #tpu.memory_space<vmem>>, vector<16x16xf32>
    %c0_19 = arith.constant 0 : index
    %c0_20 = arith.constant 0 : index
    %16 = vector.load %arg3[%c0_19, %c0_20] : memref<224x16xf32, #tpu.memory_space<vmem>>, vector<16x16xf32>
    %cst_21 = arith.constant dense<0.000000e+00> : vector<16x16xf32>
    %17 = tpu.matmul %15, %16, %cst_21 {dimension_numbers = #tpu.dot_dimension_numbers<[1], [0], [0], [1], [0, 0, 1, 1], [], []>} : vector<16x16xf32>, vector<16x16xf32>, vector<16x16xf32> -> vector<16x16xf32>
    %18 = arith.addf %14, %17 : vector<16x16xf32>
    %c6 = arith.constant 6 : index
    %c0_22 = arith.constant 0 : index
    %19 = vector.load %arg7[%c6, %c0_22] : memref<32x16xf32, #tpu.memory_space<vmem>>, vector<16x16xf32>
    %c16 = arith.constant 16 : index
    %c0_23 = arith.constant 0 : index
    %20 = vector.load %arg3[%c16, %c0_23] : memref<224x16xf32, #tpu.memory_space<vmem>>, vector<16x16xf32>
    %cst_24 = arith.constant dense<0.000000e+00> : vector<16x16xf32>
    %21 = tpu.matmul %19, %20, %cst_24 {dimension_numbers = #tpu.dot_dimension_numbers<[1], [0], [0], [1], [0, 0, 1, 1], [], []>} : vector<16x16xf32>, vector<16x16xf32>, vector<16x16xf32> -> vector<16x16xf32>
    %22 = arith.addf %18, %21 : vector<16x16xf32>
    %c7 = arith.constant 7 : index
    %c0_25 = arith.constant 0 : index
    %23 = vector.load %arg7[%c7, %c0_25] : memref<32x16xf32, #tpu.memory_space<vmem>>, vector<16x16xf32>
    %c32 = arith.constant 32 : index
    %c0_26 = arith.constant 0 : index
    %24 = vector.load %arg3[%c32, %c0_26] : memref<224x16xf32, #tpu.memory_space<vmem>>, vector<16x16xf32>
    %cst_27 = arith.constant dense<0.000000e+00> : vector<16x16xf32>
    %25 = tpu.matmul %23, %24, %cst_27 {dimension_numbers = #tpu.dot_dimension_numbers<[1], [0], [0], [1], [0, 0, 1, 1], [], []>} : vector<16x16xf32>, vector<16x16xf32>, vector<16x16xf32> -> vector<16x16xf32>
    %26 = arith.addf %22, %25 : vector<16x16xf32>
    %c8_28 = arith.constant 8 : index
    %c0_29 = arith.constant 0 : index
    %27 = vector.load %arg7[%c8_28, %c0_29] : memref<32x16xf32, #tpu.memory_space<vmem>>, vector<16x16xf32>
    %c48 = arith.constant 48 : index
    %c0_30 = arith.constant 0 : index
    %28 = vector.load %arg3[%c48, %c0_30] : memref<224x16xf32, #tpu.memory_space<vmem>>, vector<16x16xf32>
    %cst_31 = arith.constant dense<0.000000e+00> : vector<16x16xf32>
    %29 = tpu.matmul %27, %28, %cst_31 {dimension_numbers = #tpu.dot_dimension_numbers<[1], [0], [0], [1], [0, 0, 1, 1], [], []>} : vector<16x16xf32>, vector<16x16xf32>, vector<16x16xf32> -> vector<16x16xf32>
    %30 = arith.addf %26, %29 : vector<16x16xf32>
    %c9 = arith.constant 9 : index
    %c0_32 = arith.constant 0 : index
    %31 = vector.load %arg7[%c9, %c0_32] : memref<32x16xf32, #tpu.memory_space<vmem>>, vector<16x16xf32>
    %c64 = arith.constant 64 : index
    %c0_33 = arith.constant 0 : index
    %32 = vector.load %arg3[%c64, %c0_33] : memref<224x16xf32, #tpu.memory_space<vmem>>, vector<16x16xf32>
    %cst_34 = arith.constant dense<0.000000e+00> : vector<16x16xf32>
    %33 = tpu.matmul %31, %32, %cst_34 {dimension_numbers = #tpu.dot_dimension_numbers<[1], [0], [0], [1], [0, 0, 1, 1], [], []>} : vector<16x16xf32>, vector<16x16xf32>, vector<16x16xf32> -> vector<16x16xf32>
    %34 = arith.addf %30, %33 : vector<16x16xf32>
    %c10 = arith.constant 10 : index
    %c0_35 = arith.constant 0 : index
    %35 = vector.load %arg7[%c10, %c0_35] : memref<32x16xf32, #tpu.memory_space<vmem>>, vector<16x16xf32>
    %c80 = arith.constant 80 : index
    %c0_36 = arith.constant 0 : index
    %36 = vector.load %arg3[%c80, %c0_36] : memref<224x16xf32, #tpu.memory_space<vmem>>, vector<16x16xf32>
    %cst_37 = arith.constant dense<0.000000e+00> : vector<16x16xf32>
    %37 = tpu.matmul %35, %36, %cst_37 {dimension_numbers = #tpu.dot_dimension_numbers<[1], [0], [0], [1], [0, 0, 1, 1], [], []>} : vector<16x16xf32>, vector<16x16xf32>, vector<16x16xf32> -> vector<16x16xf32>
    %38 = arith.addf %34, %37 : vector<16x16xf32>
    %c11 = arith.constant 11 : index
    %c0_38 = arith.constant 0 : index
    %39 = vector.load %arg7[%c11, %c0_38] : memref<32x16xf32, #tpu.memory_space<vmem>>, vector<16x16xf32>
    %c96 = arith.constant 96 : index
    %c0_39 = arith.constant 0 : index
    %40 = vector.load %arg3[%c96, %c0_39] : memref<224x16xf32, #tpu.memory_space<vmem>>, vector<16x16xf32>
    %cst_40 = arith.constant dense<0.000000e+00> : vector<16x16xf32>
    %41 = tpu.matmul %39, %40, %cst_40 {dimension_numbers = #tpu.dot_dimension_numbers<[1], [0], [0], [1], [0, 0, 1, 1], [], []>} : vector<16x16xf32>, vector<16x16xf32>, vector<16x16xf32> -> vector<16x16xf32>
    %42 = arith.addf %38, %41 : vector<16x16xf32>
    %c5_41 = arith.constant 5 : index
    %c0_42 = arith.constant 0 : index
    %43 = vector.load %arg8[%c5_41, %c0_42] : memref<32x16xf32, #tpu.memory_space<vmem>>, vector<16x16xf32>
    %c112 = arith.constant 112 : index
    %c0_43 = arith.constant 0 : index
    %44 = vector.load %arg3[%c112, %c0_43] : memref<224x16xf32, #tpu.memory_space<vmem>>, vector<16x16xf32>
    %cst_44 = arith.constant dense<0.000000e+00> : vector<16x16xf32>
    %45 = tpu.matmul %43, %44, %cst_44 {dimension_numbers = #tpu.dot_dimension_numbers<[1], [0], [0], [1], [0, 0, 1, 1], [], []>} : vector<16x16xf32>, vector<16x16xf32>, vector<16x16xf32> -> vector<16x16xf32>
    %46 = arith.addf %42, %45 : vector<16x16xf32>
    %c6_45 = arith.constant 6 : index
    %c0_46 = arith.constant 0 : index
    %47 = vector.load %arg8[%c6_45, %c0_46] : memref<32x16xf32, #tpu.memory_space<vmem>>, vector<16x16xf32>
    %c128 = arith.constant 128 : index
    %c0_47 = arith.constant 0 : index
    %48 = vector.load %arg3[%c128, %c0_47] : memref<224x16xf32, #tpu.memory_space<vmem>>, vector<16x16xf32>
    %cst_48 = arith.constant dense<0.000000e+00> : vector<16x16xf32>
    %49 = tpu.matmul %47, %48, %cst_48 {dimension_numbers = #tpu.dot_dimension_numbers<[1], [0], [0], [1], [0, 0, 1, 1], [], []>} : vector<16x16xf32>, vector<16x16xf32>, vector<16x16xf32> -> vector<16x16xf32>
    %50 = arith.addf %46, %49 : vector<16x16xf32>
    %c7_49 = arith.constant 7 : index
    %c0_50 = arith.constant 0 : index
    %51 = vector.load %arg8[%c7_49, %c0_50] : memref<32x16xf32, #tpu.memory_space<vmem>>, vector<16x16xf32>
    %c144 = arith.constant 144 : index
    %c0_51 = arith.constant 0 : index
    %52 = vector.load %arg3[%c144, %c0_51] : memref<224x16xf32, #tpu.memory_space<vmem>>, vector<16x16xf32>
    %cst_52 = arith.constant dense<0.000000e+00> : vector<16x16xf32>
    %53 = tpu.matmul %51, %52, %cst_52 {dimension_numbers = #tpu.dot_dimension_numbers<[1], [0], [0], [1], [0, 0, 1, 1], [], []>} : vector<16x16xf32>, vector<16x16xf32>, vector<16x16xf32> -> vector<16x16xf32>
    %54 = arith.addf %50, %53 : vector<16x16xf32>
    %c8_53 = arith.constant 8 : index
    %c0_54 = arith.constant 0 : index
    %55 = vector.load %arg8[%c8_53, %c0_54] : memref<32x16xf32, #tpu.memory_space<vmem>>, vector<16x16xf32>
    %c160 = arith.constant 160 : index
    %c0_55 = arith.constant 0 : index
    %56 = vector.load %arg3[%c160, %c0_55] : memref<224x16xf32, #tpu.memory_space<vmem>>, vector<16x16xf32>
    %cst_56 = arith.constant dense<0.000000e+00> : vector<16x16xf32>
    %57 = tpu.matmul %55, %56, %cst_56 {dimension_numbers = #tpu.dot_dimension_numbers<[1], [0], [0], [1], [0, 0, 1, 1], [], []>} : vector<16x16xf32>, vector<16x16xf32>, vector<16x16xf32> -> vector<16x16xf32>
    %58 = arith.addf %54, %57 : vector<16x16xf32>
    %c9_57 = arith.constant 9 : index
    %c0_58 = arith.constant 0 : index
    %59 = vector.load %arg8[%c9_57, %c0_58] : memref<32x16xf32, #tpu.memory_space<vmem>>, vector<16x16xf32>
    %c176 = arith.constant 176 : index
    %c0_59 = arith.constant 0 : index
    %60 = vector.load %arg3[%c176, %c0_59] : memref<224x16xf32, #tpu.memory_space<vmem>>, vector<16x16xf32>
    %cst_60 = arith.constant dense<0.000000e+00> : vector<16x16xf32>
    %61 = tpu.matmul %59, %60, %cst_60 {dimension_numbers = #tpu.dot_dimension_numbers<[1], [0], [0], [1], [0, 0, 1, 1], [], []>} : vector<16x16xf32>, vector<16x16xf32>, vector<16x16xf32> -> vector<16x16xf32>
    %62 = arith.addf %58, %61 : vector<16x16xf32>
    %c10_61 = arith.constant 10 : index
    %c0_62 = arith.constant 0 : index
    %63 = vector.load %arg8[%c10_61, %c0_62] : memref<32x16xf32, #tpu.memory_space<vmem>>, vector<16x16xf32>
    %c192 = arith.constant 192 : index
    %c0_63 = arith.constant 0 : index
    %64 = vector.load %arg3[%c192, %c0_63] : memref<224x16xf32, #tpu.memory_space<vmem>>, vector<16x16xf32>
    %cst_64 = arith.constant dense<0.000000e+00> : vector<16x16xf32>
    %65 = tpu.matmul %63, %64, %cst_64 {dimension_numbers = #tpu.dot_dimension_numbers<[1], [0], [0], [1], [0, 0, 1, 1], [], []>} : vector<16x16xf32>, vector<16x16xf32>, vector<16x16xf32> -> vector<16x16xf32>
    %66 = arith.addf %62, %65 : vector<16x16xf32>
    %c11_65 = arith.constant 11 : index
    %c0_66 = arith.constant 0 : index
    %67 = vector.load %arg8[%c11_65, %c0_66] : memref<32x16xf32, #tpu.memory_space<vmem>>, vector<16x16xf32>
    %c208 = arith.constant 208 : index
    %c0_67 = arith.constant 0 : index
    %68 = vector.load %arg3[%c208, %c0_67] : memref<224x16xf32, #tpu.memory_space<vmem>>, vector<16x16xf32>
    %cst_68 = arith.constant dense<0.000000e+00> : vector<16x16xf32>
    %69 = tpu.matmul %67, %68, %cst_68 {dimension_numbers = #tpu.dot_dimension_numbers<[1], [0], [0], [1], [0, 0, 1, 1], [], []>} : vector<16x16xf32>, vector<16x16xf32>, vector<16x16xf32> -> vector<16x16xf32>
    %70 = arith.addf %66, %69 : vector<16x16xf32>
    %71 = vector.broadcast %6 : f32 to vector<16x16xf32>
    %72 = arith.addf %70, %71 : vector<16x16xf32>
    %73 = arith.negf %72 : vector<16x16xf32>
    %74 = math.exp %73 : vector<16x16xf32>
    %cst_69 = arith.constant 1.000000e+00 : f32
    %75 = vector.broadcast %cst_69 : f32 to vector<16x16xf32>
    %76 = arith.addf %75, %74 : vector<16x16xf32>
    %77 = arith.divf %75, %76 : vector<16x16xf32>
    %cst_70 = arith.constant dense<0xFF800000> : vector<4x16xf32>
    %78 = vector.multi_reduction <maximumf>, %1, %cst_70 [1] : vector<4x16x16xf32> to vector<4x16xf32>
    %cst_71 = arith.constant dense<0.000000e+00> : vector<4x16xf32>
    %79 = vector.multi_reduction <add>, %1, %cst_71 [1] : vector<4x16x16xf32> to vector<4x16xf32>
    %cst_72 = arith.constant 1.600000e+01 : f32
    %80 = vector.broadcast %cst_72 : f32 to vector<4x16xf32>
    %81 = arith.divf %79, %80 : vector<4x16xf32>
    %c1 = arith.constant 1 : index
    %82 = memref.load %arg1[%c1] : memref<3xf32, #tpu.memory_space<smem>>
    %cst_73 = arith.constant 0.000000e+00 : f32
    %83 = vector.broadcast %cst_73 : f32 to vector<3x16xf32>
    %c5_74 = arith.constant 5 : index
    %c0_75 = arith.constant 0 : index
    %84 = vector.load %arg9[%c5_74, %c0_75] : memref<20x16xf32, #tpu.memory_space<vmem>>, vector<3x16xf32>
    tpu.vector_store %arg9[%c5_74, %c0_75], %83 {strides = array<i32>} : memref<20x16xf32, #tpu.memory_space<vmem>>, vector<3x16xf32>,
    %c12 = arith.constant 12 : index
    %c0_76 = arith.constant 0 : index
    %85 = vector.load %arg9[%c12, %c0_76] : memref<20x16xf32, #tpu.memory_space<vmem>>, vector<3x16xf32>
    tpu.vector_store %arg9[%c12, %c0_76], %83 {strides = array<i32>} : memref<20x16xf32, #tpu.memory_space<vmem>>, vector<3x16xf32>,
    %c8_77 = arith.constant 8 : index
    %c0_78 = arith.constant 0 : index
    %86 = vector.load %arg9[%c8_77, %c0_78] : memref<20x16xf32, #tpu.memory_space<vmem>>, vector<4x16xf32>
    tpu.vector_store %arg9[%c8_77, %c0_78], %78 {strides = array<i32>} : memref<20x16xf32, #tpu.memory_space<vmem>>, vector<4x16xf32>,
    %c5_79 = arith.constant 5 : index
    %c0_80 = arith.constant 0 : index
    %87 = vector.load %arg10[%c5_79, %c0_80] : memref<20x16xf32, #tpu.memory_space<vmem>>, vector<3x16xf32>
    tpu.vector_store %arg10[%c5_79, %c0_80], %83 {strides = array<i32>} : memref<20x16xf32, #tpu.memory_space<vmem>>, vector<3x16xf32>,
    %c12_81 = arith.constant 12 : index
    %c0_82 = arith.constant 0 : index
    %88 = vector.load %arg10[%c12_81, %c0_82] : memref<20x16xf32, #tpu.memory_space<vmem>>, vector<3x16xf32>
    tpu.vector_store %arg10[%c12_81, %c0_82], %83 {strides = array<i32>} : memref<20x16xf32, #tpu.memory_space<vmem>>, vector<3x16xf32>,
    %c8_83 = arith.constant 8 : index
    %c0_84 = arith.constant 0 : index
    %89 = vector.load %arg10[%c8_83, %c0_84] : memref<20x16xf32, #tpu.memory_space<vmem>>, vector<4x16xf32>
    tpu.vector_store %arg10[%c8_83, %c0_84], %81 {strides = array<i32>} : memref<20x16xf32, #tpu.memory_space<vmem>>, vector<4x16xf32>,
    %cst_85 = arith.constant 0.000000e+00 : f32
    %90 = vector.broadcast %cst_85 : f32 to vector<4x16xf32>
    %c5_86 = arith.constant 5 : index
    %c0_87 = arith.constant 0 : index
    %91 = vector.load %arg9[%c5_86, %c0_87] : memref<20x16xf32, #tpu.memory_space<vmem>>, vector<4x16xf32>
    %c0_88 = arith.constant 0 : index
    %c0_89 = arith.constant 0 : index
    %92 = vector.load %arg4[%c0_88, %c0_89] : memref<224x16xf32, #tpu.memory_space<vmem>>, vector<16x16xf32>
    %cst_90 = arith.constant dense<0.000000e+00> : vector<4x16xf32>
    %93 = tpu.matmul %91, %92, %cst_90 {dimension_numbers = #tpu.dot_dimension_numbers<[1], [0], [0], [1], [0, 0, 1, 1], [], []>} : vector<4x16xf32>, vector<16x16xf32>, vector<4x16xf32> -> vector<4x16xf32>
    %94 = arith.addf %90, %93 : vector<4x16xf32>
    %c6_91 = arith.constant 6 : index
    %c0_92 = arith.constant 0 : index
    %95 = vector.load %arg9[%c6_91, %c0_92] : memref<20x16xf32, #tpu.memory_space<vmem>>, vector<4x16xf32>
    %c16_93 = arith.constant 16 : index
    %c0_94 = arith.constant 0 : index
    %96 = vector.load %arg4[%c16_93, %c0_94] : memref<224x16xf32, #tpu.memory_space<vmem>>, vector<16x16xf32>
    %cst_95 = arith.constant dense<0.000000e+00> : vector<4x16xf32>
    %97 = tpu.matmul %95, %96, %cst_95 {dimension_numbers = #tpu.dot_dimension_numbers<[1], [0], [0], [1], [0, 0, 1, 1], [], []>} : vector<4x16xf32>, vector<16x16xf32>, vector<4x16xf32> -> vector<4x16xf32>
    %98 = arith.addf %94, %97 : vector<4x16xf32>
    %c7_96 = arith.constant 7 : index
    %c0_97 = arith.constant 0 : index
    %99 = vector.load %arg9[%c7_96, %c0_97] : memref<20x16xf32, #tpu.memory_space<vmem>>, vector<4x16xf32>
    %c32_98 = arith.constant 32 : index
    %c0_99 = arith.constant 0 : index
    %100 = vector.load %arg4[%c32_98, %c0_99] : memref<224x16xf32, #tpu.memory_space<vmem>>, vector<16x16xf32>
    %cst_100 = arith.constant dense<0.000000e+00> : vector<4x16xf32>
    %101 = tpu.matmul %99, %100, %cst_100 {dimension_numbers = #tpu.dot_dimension_numbers<[1], [0], [0], [1], [0, 0, 1, 1], [], []>} : vector<4x16xf32>, vector<16x16xf32>, vector<4x16xf32> -> vector<4x16xf32>
    %102 = arith.addf %98, %101 : vector<4x16xf32>
    %c8_101 = arith.constant 8 : index
    %c0_102 = arith.constant 0 : index
    %103 = vector.load %arg9[%c8_101, %c0_102] : memref<20x16xf32, #tpu.memory_space<vmem>>, vector<4x16xf32>
    %c48_103 = arith.constant 48 : index
    %c0_104 = arith.constant 0 : index
    %104 = vector.load %arg4[%c48_103, %c0_104] : memref<224x16xf32, #tpu.memory_space<vmem>>, vector<16x16xf32>
    %cst_105 = arith.constant dense<0.000000e+00> : vector<4x16xf32>
    %105 = tpu.matmul %103, %104, %cst_105 {dimension_numbers = #tpu.dot_dimension_numbers<[1], [0], [0], [1], [0, 0, 1, 1], [], []>} : vector<4x16xf32>, vector<16x16xf32>, vector<4x16xf32> -> vector<4x16xf32>
    %106 = arith.addf %102, %105 : vector<4x16xf32>
    %c9_106 = arith.constant 9 : index
    %c0_107 = arith.constant 0 : index
    %107 = vector.load %arg9[%c9_106, %c0_107] : memref<20x16xf32, #tpu.memory_space<vmem>>, vector<4x16xf32>
    %c64_108 = arith.constant 64 : index
    %c0_109 = arith.constant 0 : index
    %108 = vector.load %arg4[%c64_108, %c0_109] : memref<224x16xf32, #tpu.memory_space<vmem>>, vector<16x16xf32>
    %cst_110 = arith.constant dense<0.000000e+00> : vector<4x16xf32>
    %109 = tpu.matmul %107, %108, %cst_110 {dimension_numbers = #tpu.dot_dimension_numbers<[1], [0], [0], [1], [0, 0, 1, 1], [], []>} : vector<4x16xf32>, vector<16x16xf32>, vector<4x16xf32> -> vector<4x16xf32>
    %110 = arith.addf %106, %109 : vector<4x16xf32>
    %c10_111 = arith.constant 10 : index
    %c0_112 = arith.constant 0 : index
    %111 = vector.load %arg9[%c10_111, %c0_112] : memref<20x16xf32, #tpu.memory_space<vmem>>, vector<4x16xf32>
    %c80_113 = arith.constant 80 : index
    %c0_114 = arith.constant 0 : index
    %112 = vector.load %arg4[%c80_113, %c0_114] : memref<224x16xf32, #tpu.memory_space<vmem>>, vector<16x16xf32>
    %cst_115 = arith.constant dense<0.000000e+00> : vector<4x16xf32>
    %113 = tpu.matmul %111, %112, %cst_115 {dimension_numbers = #tpu.dot_dimension_numbers<[1], [0], [0], [1], [0, 0, 1, 1], [], []>} : vector<4x16xf32>, vector<16x16xf32>, vector<4x16xf32> -> vector<4x16xf32>
    %114 = arith.addf %110, %113 : vector<4x16xf32>
    %c11_116 = arith.constant 11 : index
    %c0_117 = arith.constant 0 : index
    %115 = vector.load %arg9[%c11_116, %c0_117] : memref<20x16xf32, #tpu.memory_space<vmem>>, vector<4x16xf32>
    %c96_118 = arith.constant 96 : index
    %c0_119 = arith.constant 0 : index
    %116 = vector.load %arg4[%c96_118, %c0_119] : memref<224x16xf32, #tpu.memory_space<vmem>>, vector<16x16xf32>
    %cst_120 = arith.constant dense<0.000000e+00> : vector<4x16xf32>
    %117 = tpu.matmul %115, %116, %cst_120 {dimension_numbers = #tpu.dot_dimension_numbers<[1], [0], [0], [1], [0, 0, 1, 1], [], []>} : vector<4x16xf32>, vector<16x16xf32>, vector<4x16xf32> -> vector<4x16xf32>
    %118 = arith.addf %114, %117 : vector<4x16xf32>
    %c5_121 = arith.constant 5 : index
    %c0_122 = arith.constant 0 : index
    %119 = vector.load %arg10[%c5_121, %c0_122] : memref<20x16xf32, #tpu.memory_space<vmem>>, vector<4x16xf32>
    %c112_123 = arith.constant 112 : index
    %c0_124 = arith.constant 0 : index
    %120 = vector.load %arg4[%c112_123, %c0_124] : memref<224x16xf32, #tpu.memory_space<vmem>>, vector<16x16xf32>
    %cst_125 = arith.constant dense<0.000000e+00> : vector<4x16xf32>
    %121 = tpu.matmul %119, %120, %cst_125 {dimension_numbers = #tpu.dot_dimension_numbers<[1], [0], [0], [1], [0, 0, 1, 1], [], []>} : vector<4x16xf32>, vector<16x16xf32>, vector<4x16xf32> -> vector<4x16xf32>
    %122 = arith.addf %118, %121 : vector<4x16xf32>
    %c6_126 = arith.constant 6 : index
    %c0_127 = arith.constant 0 : index
    %123 = vector.load %arg10[%c6_126, %c0_127] : memref<20x16xf32, #tpu.memory_space<vmem>>, vector<4x16xf32>
    %c128_128 = arith.constant 128 : index
    %c0_129 = arith.constant 0 : index
    %124 = vector.load %arg4[%c128_128, %c0_129] : memref<224x16xf32, #tpu.memory_space<vmem>>, vector<16x16xf32>
    %cst_130 = arith.constant dense<0.000000e+00> : vector<4x16xf32>
    %125 = tpu.matmul %123, %124, %cst_130 {dimension_numbers = #tpu.dot_dimension_numbers<[1], [0], [0], [1], [0, 0, 1, 1], [], []>} : vector<4x16xf32>, vector<16x16xf32>, vector<4x16xf32> -> vector<4x16xf32>
    %126 = arith.addf %122, %125 : vector<4x16xf32>
    %c7_131 = arith.constant 7 : index
    %c0_132 = arith.constant 0 : index
    %127 = vector.load %arg10[%c7_131, %c0_132] : memref<20x16xf32, #tpu.memory_space<vmem>>, vector<4x16xf32>
    %c144_133 = arith.constant 144 : index
    %c0_134 = arith.constant 0 : index
    %128 = vector.load %arg4[%c144_133, %c0_134] : memref<224x16xf32, #tpu.memory_space<vmem>>, vector<16x16xf32>
    %cst_135 = arith.constant dense<0.000000e+00> : vector<4x16xf32>
    %129 = tpu.matmul %127, %128, %cst_135 {dimension_numbers = #tpu.dot_dimension_numbers<[1], [0], [0], [1], [0, 0, 1, 1], [], []>} : vector<4x16xf32>, vector<16x16xf32>, vector<4x16xf32> -> vector<4x16xf32>
    %130 = arith.addf %126, %129 : vector<4x16xf32>
    %c8_136 = arith.constant 8 : index
    %c0_137 = arith.constant 0 : index
    %131 = vector.load %arg10[%c8_136, %c0_137] : memref<20x16xf32, #tpu.memory_space<vmem>>, vector<4x16xf32>
    %c160_138 = arith.constant 160 : index
    %c0_139 = arith.constant 0 : index
    %132 = vector.load %arg4[%c160_138, %c0_139] : memref<224x16xf32, #tpu.memory_space<vmem>>, vector<16x16xf32>
    %cst_140 = arith.constant dense<0.000000e+00> : vector<4x16xf32>
    %133 = tpu.matmul %131, %132, %cst_140 {dimension_numbers = #tpu.dot_dimension_numbers<[1], [0], [0], [1], [0, 0, 1, 1], [], []>} : vector<4x16xf32>, vector<16x16xf32>, vector<4x16xf32> -> vector<4x16xf32>
    %134 = arith.addf %130, %133 : vector<4x16xf32>
    %c9_141 = arith.constant 9 : index
    %c0_142 = arith.constant 0 : index
    %135 = vector.load %arg10[%c9_141, %c0_142] : memref<20x16xf32, #tpu.memory_space<vmem>>, vector<4x16xf32>
    %c176_143 = arith.constant 176 : index
    %c0_144 = arith.constant 0 : index
    %136 = vector.load %arg4[%c176_143, %c0_144] : memref<224x16xf32, #tpu.memory_space<vmem>>, vector<16x16xf32>
    %cst_145 = arith.constant dense<0.000000e+00> : vector<4x16xf32>
    %137 = tpu.matmul %135, %136, %cst_145 {dimension_numbers = #tpu.dot_dimension_numbers<[1], [0], [0], [1], [0, 0, 1, 1], [], []>} : vector<4x16xf32>, vector<16x16xf32>, vector<4x16xf32> -> vector<4x16xf32>
    %138 = arith.addf %134, %137 : vector<4x16xf32>
    %c10_146 = arith.constant 10 : index
    %c0_147 = arith.constant 0 : index
    %139 = vector.load %arg10[%c10_146, %c0_147] : memref<20x16xf32, #tpu.memory_space<vmem>>, vector<4x16xf32>
    %c192_148 = arith.constant 192 : index
    %c0_149 = arith.constant 0 : index
    %140 = vector.load %arg4[%c192_148, %c0_149] : memref<224x16xf32, #tpu.memory_space<vmem>>, vector<16x16xf32>
    %cst_150 = arith.constant dense<0.000000e+00> : vector<4x16xf32>
    %141 = tpu.matmul %139, %140, %cst_150 {dimension_numbers = #tpu.dot_dimension_numbers<[1], [0], [0], [1], [0, 0, 1, 1], [], []>} : vector<4x16xf32>, vector<16x16xf32>, vector<4x16xf32> -> vector<4x16xf32>
    %142 = arith.addf %138, %141 : vector<4x16xf32>
    %c11_151 = arith.constant 11 : index
    %c0_152 = arith.constant 0 : index
    %143 = vector.load %arg10[%c11_151, %c0_152] : memref<20x16xf32, #tpu.memory_space<vmem>>, vector<4x16xf32>
    %c208_153 = arith.constant 208 : index
    %c0_154 = arith.constant 0 : index
    %144 = vector.load %arg4[%c208_153, %c0_154] : memref<224x16xf32, #tpu.memory_space<vmem>>, vector<16x16xf32>
    %cst_155 = arith.constant dense<0.000000e+00> : vector<4x16xf32>
    %145 = tpu.matmul %143, %144, %cst_155 {dimension_numbers = #tpu.dot_dimension_numbers<[1], [0], [0], [1], [0, 0, 1, 1], [], []>} : vector<4x16xf32>, vector<16x16xf32>, vector<4x16xf32> -> vector<4x16xf32>
    %146 = arith.addf %142, %145 : vector<4x16xf32>
    %147 = vector.broadcast %82 : f32 to vector<4x16xf32>
    %148 = arith.addf %146, %147 : vector<4x16xf32>
    %149 = arith.negf %148 : vector<4x16xf32>
    %150 = math.exp %149 : vector<4x16xf32>
    %cst_156 = arith.constant 1.000000e+00 : f32
    %151 = vector.broadcast %cst_156 : f32 to vector<4x16xf32>
    %152 = arith.addf %151, %150 : vector<4x16xf32>
    %153 = arith.divf %151, %152 : vector<4x16xf32>
    %cst_157 = arith.constant dense<0xFF800000> : vector<4x16xf32>
    %154 = vector.multi_reduction <maximumf>, %1, %cst_157 [2] : vector<4x16x16xf32> to vector<4x16xf32>
    %cst_158 = arith.constant dense<0.000000e+00> : vector<4x16xf32>
    %155 = vector.multi_reduction <add>, %1, %cst_158 [2] : vector<4x16x16xf32> to vector<4x16xf32>
    %cst_159 = arith.constant 1.600000e+01 : f32
    %156 = vector.broadcast %cst_159 : f32 to vector<4x16xf32>
    %157 = arith.divf %155, %156 : vector<4x16xf32>
    %c2 = arith.constant 2 : index
    %158 = memref.load %arg1[%c2] : memref<3xf32, #tpu.memory_space<smem>>
    %cst_160 = arith.constant 0.000000e+00 : f32
    %159 = vector.broadcast %cst_160 : f32 to vector<3x16xf32>
    %c5_161 = arith.constant 5 : index
    %c0_162 = arith.constant 0 : index
    %160 = vector.load %arg11[%c5_161, %c0_162] : memref<20x16xf32, #tpu.memory_space<vmem>>, vector<3x16xf32>
    tpu.vector_store %arg11[%c5_161, %c0_162], %159 {strides = array<i32>} : memref<20x16xf32, #tpu.memory_space<vmem>>, vector<3x16xf32>,
    %c12_163 = arith.constant 12 : index
    %c0_164 = arith.constant 0 : index
    %161 = vector.load %arg11[%c12_163, %c0_164] : memref<20x16xf32, #tpu.memory_space<vmem>>, vector<3x16xf32>
    tpu.vector_store %arg11[%c12_163, %c0_164], %159 {strides = array<i32>} : memref<20x16xf32, #tpu.memory_space<vmem>>, vector<3x16xf32>,
    %c8_165 = arith.constant 8 : index
    %c0_166 = arith.constant 0 : index
    %162 = vector.load %arg11[%c8_165, %c0_166] : memref<20x16xf32, #tpu.memory_space<vmem>>, vector<4x16xf32>
    tpu.vector_store %arg11[%c8_165, %c0_166], %154 {strides = array<i32>} : memref<20x16xf32, #tpu.memory_space<vmem>>, vector<4x16xf32>,
    %c5_167 = arith.constant 5 : index
    %c0_168 = arith.constant 0 : index
    %163 = vector.load %arg12[%c5_167, %c0_168] : memref<20x16xf32, #tpu.memory_space<vmem>>, vector<3x16xf32>
    tpu.vector_store %arg12[%c5_167, %c0_168], %159 {strides = array<i32>} : memref<20x16xf32, #tpu.memory_space<vmem>>, vector<3x16xf32>,
    %c12_169 = arith.constant 12 : index
    %c0_170 = arith.constant 0 : index
    %164 = vector.load %arg12[%c12_169, %c0_170] : memref<20x16xf32, #tpu.memory_space<vmem>>, vector<3x16xf32>
    tpu.vector_store %arg12[%c12_169, %c0_170], %159 {strides = array<i32>} : memref<20x16xf32, #tpu.memory_space<vmem>>, vector<3x16xf32>,
    %c8_171 = arith.constant 8 : index
    %c0_172 = arith.constant 0 : index
    %165 = vector.load %arg12[%c8_171, %c0_172] : memref<20x16xf32, #tpu.memory_space<vmem>>, vector<4x16xf32>
    tpu.vector_store %arg12[%c8_171, %c0_172], %157 {strides = array<i32>} : memref<20x16xf32, #tpu.memory_space<vmem>>, vector<4x16xf32>,
    %cst_173 = arith.constant 0.000000e+00 : f32
    %166 = vector.broadcast %cst_173 : f32 to vector<4x16xf32>
    %c5_174 = arith.constant 5 : index
    %c0_175 = arith.constant 0 : index
    %167 = vector.load %arg11[%c5_174, %c0_175] : memref<20x16xf32, #tpu.memory_space<vmem>>, vector<4x16xf32>
    %c0_176 = arith.constant 0 : index
    %c0_177 = arith.constant 0 : index
    %168 = vector.load %arg5[%c0_176, %c0_177] : memref<224x16xf32, #tpu.memory_space<vmem>>, vector<16x16xf32>
    %cst_178 = arith.constant dense<0.000000e+00> : vector<4x16xf32>
    %169 = tpu.matmul %167, %168, %cst_178 {dimension_numbers = #tpu.dot_dimension_numbers<[1], [0], [0], [1], [0, 0, 1, 1], [], []>} : vector<4x16xf32>, vector<16x16xf32>, vector<4x16xf32> -> vector<4x16xf32>
    %170 = arith.addf %166, %169 : vector<4x16xf32>
    %c6_179 = arith.constant 6 : index
    %c0_180 = arith.constant 0 : index
    %171 = vector.load %arg11[%c6_179, %c0_180] : memref<20x16xf32, #tpu.memory_space<vmem>>, vector<4x16xf32>
    %c16_181 = arith.constant 16 : index
    %c0_182 = arith.constant 0 : index
    %172 = vector.load %arg5[%c16_181, %c0_182] : memref<224x16xf32, #tpu.memory_space<vmem>>, vector<16x16xf32>
    %cst_183 = arith.constant dense<0.000000e+00> : vector<4x16xf32>
    %173 = tpu.matmul %171, %172, %cst_183 {dimension_numbers = #tpu.dot_dimension_numbers<[1], [0], [0], [1], [0, 0, 1, 1], [], []>} : vector<4x16xf32>, vector<16x16xf32>, vector<4x16xf32> -> vector<4x16xf32>
    %174 = arith.addf %170, %173 : vector<4x16xf32>
    %c7_184 = arith.constant 7 : index
    %c0_185 = arith.constant 0 : index
    %175 = vector.load %arg11[%c7_184, %c0_185] : memref<20x16xf32, #tpu.memory_space<vmem>>, vector<4x16xf32>
    %c32_186 = arith.constant 32 : index
    %c0_187 = arith.constant 0 : index
    %176 = vector.load %arg5[%c32_186, %c0_187] : memref<224x16xf32, #tpu.memory_space<vmem>>, vector<16x16xf32>
    %cst_188 = arith.constant dense<0.000000e+00> : vector<4x16xf32>
    %177 = tpu.matmul %175, %176, %cst_188 {dimension_numbers = #tpu.dot_dimension_numbers<[1], [0], [0], [1], [0, 0, 1, 1], [], []>} : vector<4x16xf32>, vector<16x16xf32>, vector<4x16xf32> -> vector<4x16xf32>
    %178 = arith.addf %174, %177 : vector<4x16xf32>
    %c8_189 = arith.constant 8 : index
    %c0_190 = arith.constant 0 : index
    %179 = vector.load %arg11[%c8_189, %c0_190] : memref<20x16xf32, #tpu.memory_space<vmem>>, vector<4x16xf32>
    %c48_191 = arith.constant 48 : index
    %c0_192 = arith.constant 0 : index
    %180 = vector.load %arg5[%c48_191, %c0_192] : memref<224x16xf32, #tpu.memory_space<vmem>>, vector<16x16xf32>
    %cst_193 = arith.constant dense<0.000000e+00> : vector<4x16xf32>
    %181 = tpu.matmul %179, %180, %cst_193 {dimension_numbers = #tpu.dot_dimension_numbers<[1], [0], [0], [1], [0, 0, 1, 1], [], []>} : vector<4x16xf32>, vector<16x16xf32>, vector<4x16xf32> -> vector<4x16xf32>
    %182 = arith.addf %178, %181 : vector<4x16xf32>
    %c9_194 = arith.constant 9 : index
    %c0_195 = arith.constant 0 : index
    %183 = vector.load %arg11[%c9_194, %c0_195] : memref<20x16xf32, #tpu.memory_space<vmem>>, vector<4x16xf32>
    %c64_196 = arith.constant 64 : index
    %c0_197 = arith.constant 0 : index
    %184 = vector.load %arg5[%c64_196, %c0_197] : memref<224x16xf32, #tpu.memory_space<vmem>>, vector<16x16xf32>
    %cst_198 = arith.constant dense<0.000000e+00> : vector<4x16xf32>
    %185 = tpu.matmul %183, %184, %cst_198 {dimension_numbers = #tpu.dot_dimension_numbers<[1], [0], [0], [1], [0, 0, 1, 1], [], []>} : vector<4x16xf32>, vector<16x16xf32>, vector<4x16xf32> -> vector<4x16xf32>
    %186 = arith.addf %182, %185 : vector<4x16xf32>
    %c10_199 = arith.constant 10 : index
    %c0_200 = arith.constant 0 : index
    %187 = vector.load %arg11[%c10_199, %c0_200] : memref<20x16xf32, #tpu.memory_space<vmem>>, vector<4x16xf32>
    %c80_201 = arith.constant 80 : index
    %c0_202 = arith.constant 0 : index
    %188 = vector.load %arg5[%c80_201, %c0_202] : memref<224x16xf32, #tpu.memory_space<vmem>>, vector<16x16xf32>
    %cst_203 = arith.constant dense<0.000000e+00> : vector<4x16xf32>
    %189 = tpu.matmul %187, %188, %cst_203 {dimension_numbers = #tpu.dot_dimension_numbers<[1], [0], [0], [1], [0, 0, 1, 1], [], []>} : vector<4x16xf32>, vector<16x16xf32>, vector<4x16xf32> -> vector<4x16xf32>
    %190 = arith.addf %186, %189 : vector<4x16xf32>
    %c11_204 = arith.constant 11 : index
    %c0_205 = arith.constant 0 : index
    %191 = vector.load %arg11[%c11_204, %c0_205] : memref<20x16xf32, #tpu.memory_space<vmem>>, vector<4x16xf32>
    %c96_206 = arith.constant 96 : index
    %c0_207 = arith.constant 0 : index
    %192 = vector.load %arg5[%c96_206, %c0_207] : memref<224x16xf32, #tpu.memory_space<vmem>>, vector<16x16xf32>
    %cst_208 = arith.constant dense<0.000000e+00> : vector<4x16xf32>
    %193 = tpu.matmul %191, %192, %cst_208 {dimension_numbers = #tpu.dot_dimension_numbers<[1], [0], [0], [1], [0, 0, 1, 1], [], []>} : vector<4x16xf32>, vector<16x16xf32>, vector<4x16xf32> -> vector<4x16xf32>
    %194 = arith.addf %190, %193 : vector<4x16xf32>
    %c5_209 = arith.constant 5 : index
    %c0_210 = arith.constant 0 : index
    %195 = vector.load %arg12[%c5_209, %c0_210] : memref<20x16xf32, #tpu.memory_space<vmem>>, vector<4x16xf32>
    %c112_211 = arith.constant 112 : index
    %c0_212 = arith.constant 0 : index
    %196 = vector.load %arg5[%c112_211, %c0_212] : memref<224x16xf32, #tpu.memory_space<vmem>>, vector<16x16xf32>
    %cst_213 = arith.constant dense<0.000000e+00> : vector<4x16xf32>
    %197 = tpu.matmul %195, %196, %cst_213 {dimension_numbers = #tpu.dot_dimension_numbers<[1], [0], [0], [1], [0, 0, 1, 1], [], []>} : vector<4x16xf32>, vector<16x16xf32>, vector<4x16xf32> -> vector<4x16xf32>
    %198 = arith.addf %194, %197 : vector<4x16xf32>
    %c6_214 = arith.constant 6 : index
    %c0_215 = arith.constant 0 : index
    %199 = vector.load %arg12[%c6_214, %c0_215] : memref<20x16xf32, #tpu.memory_space<vmem>>, vector<4x16xf32>
    %c128_216 = arith.constant 128 : index
    %c0_217 = arith.constant 0 : index
    %200 = vector.load %arg5[%c128_216, %c0_217] : memref<224x16xf32, #tpu.memory_space<vmem>>, vector<16x16xf32>
    %cst_218 = arith.constant dense<0.000000e+00> : vector<4x16xf32>
    %201 = tpu.matmul %199, %200, %cst_218 {dimension_numbers = #tpu.dot_dimension_numbers<[1], [0], [0], [1], [0, 0, 1, 1], [], []>} : vector<4x16xf32>, vector<16x16xf32>, vector<4x16xf32> -> vector<4x16xf32>
    %202 = arith.addf %198, %201 : vector<4x16xf32>
    %c7_219 = arith.constant 7 : index
    %c0_220 = arith.constant 0 : index
    %203 = vector.load %arg12[%c7_219, %c0_220] : memref<20x16xf32, #tpu.memory_space<vmem>>, vector<4x16xf32>
    %c144_221 = arith.constant 144 : index
    %c0_222 = arith.constant 0 : index
    %204 = vector.load %arg5[%c144_221, %c0_222] : memref<224x16xf32, #tpu.memory_space<vmem>>, vector<16x16xf32>
    %cst_223 = arith.constant dense<0.000000e+00> : vector<4x16xf32>
    %205 = tpu.matmul %203, %204, %cst_223 {dimension_numbers = #tpu.dot_dimension_numbers<[1], [0], [0], [1], [0, 0, 1, 1], [], []>} : vector<4x16xf32>, vector<16x16xf32>, vector<4x16xf32> -> vector<4x16xf32>
    %206 = arith.addf %202, %205 : vector<4x16xf32>
    %c8_224 = arith.constant 8 : index
    %c0_225 = arith.constant 0 : index
    %207 = vector.load %arg12[%c8_224, %c0_225] : memref<20x16xf32, #tpu.memory_space<vmem>>, vector<4x16xf32>
    %c160_226 = arith.constant 160 : index
    %c0_227 = arith.constant 0 : index
    %208 = vector.load %arg5[%c160_226, %c0_227] : memref<224x16xf32, #tpu.memory_space<vmem>>, vector<16x16xf32>
    %cst_228 = arith.constant dense<0.000000e+00> : vector<4x16xf32>
    %209 = tpu.matmul %207, %208, %cst_228 {dimension_numbers = #tpu.dot_dimension_numbers<[1], [0], [0], [1], [0, 0, 1, 1], [], []>} : vector<4x16xf32>, vector<16x16xf32>, vector<4x16xf32> -> vector<4x16xf32>
    %210 = arith.addf %206, %209 : vector<4x16xf32>
    %c9_229 = arith.constant 9 : index
    %c0_230 = arith.constant 0 : index
    %211 = vector.load %arg12[%c9_229, %c0_230] : memref<20x16xf32, #tpu.memory_space<vmem>>, vector<4x16xf32>
    %c176_231 = arith.constant 176 : index
    %c0_232 = arith.constant 0 : index
    %212 = vector.load %arg5[%c176_231, %c0_232] : memref<224x16xf32, #tpu.memory_space<vmem>>, vector<16x16xf32>
    %cst_233 = arith.constant dense<0.000000e+00> : vector<4x16xf32>
    %213 = tpu.matmul %211, %212, %cst_233 {dimension_numbers = #tpu.dot_dimension_numbers<[1], [0], [0], [1], [0, 0, 1, 1], [], []>} : vector<4x16xf32>, vector<16x16xf32>, vector<4x16xf32> -> vector<4x16xf32>
    %214 = arith.addf %210, %213 : vector<4x16xf32>
    %c10_234 = arith.constant 10 : index
    %c0_235 = arith.constant 0 : index
    %215 = vector.load %arg12[%c10_234, %c0_235] : memref<20x16xf32, #tpu.memory_space<vmem>>, vector<4x16xf32>
    %c192_236 = arith.constant 192 : index
    %c0_237 = arith.constant 0 : index
    %216 = vector.load %arg5[%c192_236, %c0_237] : memref<224x16xf32, #tpu.memory_space<vmem>>, vector<16x16xf32>
    %cst_238 = arith.constant dense<0.000000e+00> : vector<4x16xf32>
    %217 = tpu.matmul %215, %216, %cst_238 {dimension_numbers = #tpu.dot_dimension_numbers<[1], [0], [0], [1], [0, 0, 1, 1], [], []>} : vector<4x16xf32>, vector<16x16xf32>, vector<4x16xf32> -> vector<4x16xf32>
    %218 = arith.addf %214, %217 : vector<4x16xf32>
    %c11_239 = arith.constant 11 : index
    %c0_240 = arith.constant 0 : index
    %219 = vector.load %arg12[%c11_239, %c0_240] : memref<20x16xf32, #tpu.memory_space<vmem>>, vector<4x16xf32>
    %c208_241 = arith.constant 208 : index
    %c0_242 = arith.constant 0 : index
    %220 = vector.load %arg5[%c208_241, %c0_242] : memref<224x16xf32, #tpu.memory_space<vmem>>, vector<16x16xf32>
    %cst_243 = arith.constant dense<0.000000e+00> : vector<4x16xf32>
    %221 = tpu.matmul %219, %220, %cst_243 {dimension_numbers = #tpu.dot_dimension_numbers<[1], [0], [0], [1], [0, 0, 1, 1], [], []>} : vector<4x16xf32>, vector<16x16xf32>, vector<4x16xf32> -> vector<4x16xf32>
    %222 = arith.addf %218, %221 : vector<4x16xf32>
    %223 = vector.broadcast %158 : f32 to vector<4x16xf32>
    %224 = arith.addf %222, %223 : vector<4x16xf32>
    %225 = arith.negf %224 : vector<4x16xf32>
    %226 = math.exp %225 : vector<4x16xf32>
    %cst_244 = arith.constant 1.000000e+00 : f32
    %227 = vector.broadcast %cst_244 : f32 to vector<4x16xf32>
    %228 = arith.addf %227, %226 : vector<4x16xf32>
    %229 = arith.divf %227, %228 : vector<4x16xf32>
    %230 = vector.shape_cast %77 : vector<16x16xf32> to vector<1x16x16xf32>
    %231 = vector.shape_cast %153 : vector<4x16xf32> to vector<4x1x16xf32>
    %232 = vector.broadcast %230 : vector<1x16x16xf32> to vector<4x16x16xf32>
    %233 = vector.broadcast %231 : vector<4x1x16xf32> to vector<4x16x16xf32>
    %234 = arith.addf %232, %233 : vector<4x16x16xf32>
    %235 = vector.shape_cast %229 : vector<4x16xf32> to vector<4x16x1xf32>
    %236 = vector.broadcast %235 : vector<4x16x1xf32> to vector<4x16x16xf32>
    %237 = arith.addf %234, %236 : vector<4x16x16xf32>
    %238 = arith.mulf %1, %237 : vector<4x16x16xf32>
    %cst_245 = arith.constant 0.333333343 : f32
    %239 = vector.broadcast %cst_245 : f32 to vector<4x16x16xf32>
    %240 = arith.mulf %238, %239 : vector<4x16x16xf32>
    %c0_246 = arith.constant 0 : index
    %c0_247 = arith.constant 0 : index
    %c0_248 = arith.constant 0 : index
    %c0_249 = arith.constant 0 : index
    %241 = vector.load %arg6[%c0_246, %c0_247, %c0_248, %c0_249] : memref<1x4x16x16xf32, #tpu.memory_space<vmem>>, vector<1x4x16x16xf32>
    %242 = vector.shape_cast %241 : vector<1x4x16x16xf32> to vector<4x16x16xf32>
    %243 = vector.shape_cast %240 : vector<4x16x16xf32> to vector<1x4x16x16xf32>
    tpu.vector_store %arg6[%c0_246, %c0_247, %c0_248, %c0_249], %243 {strides = array<i32>} : memref<1x4x16x16xf32, #tpu.memory_space<vmem>>, vector<1x4x16x16xf32>,
    return
  }
  func.func @transform_0(%arg0: i32, %arg1: memref<3xf32, #tpu.memory_space<smem>>) -> (i32, i32, i32, i32) {
    %c0_i32 = arith.constant 0 : i32
    %c0_i32_0 = arith.constant 0 : i32
    %c0_i32_1 = arith.constant 0 : i32
    %c0_i32_2 = arith.constant 0 : i32
    return %arg0, %c0_i32, %c0_i32_0, %c0_i32_1 : i32, i32, i32, i32
  }
  func.func @transform_1(%arg0: i32, %arg1: memref<3xf32, #tpu.memory_space<smem>>) -> (i32, i32) {
    %c0_i32 = arith.constant 0 : i32
    %c0_i32_0 = arith.constant 0 : i32
    %c0_i32_1 = arith.constant 0 : i32
    return %c0_i32, %c0_i32_0 : i32, i32
  }
  func.func @transform_2(%arg0: i32, %arg1: memref<3xf32, #tpu.memory_space<smem>>) -> (i32, i32) {
    %c0_i32 = arith.constant 0 : i32
    %c0_i32_0 = arith.constant 0 : i32
    %c0_i32_1 = arith.constant 0 : i32
    return %c0_i32, %c0_i32_0 : i32, i32
  }
  func.func @transform_3(%arg0: i32, %arg1: memref<3xf32, #tpu.memory_space<smem>>) -> (i32, i32) {
    %c0_i32 = arith.constant 0 : i32
    %c0_i32_0 = arith.constant 0 : i32
    %c0_i32_1 = arith.constant 0 : i32
    return %c0_i32, %c0_i32_0 : i32, i32
  }
  func.func @transform_4(%arg0: i32, %arg1: memref<3xf32, #tpu.memory_space<smem>>) -> (i32, i32, i32, i32) {
    %c0_i32 = arith.constant 0 : i32
    %c0_i32_0 = arith.constant 0 : i32
    %c0_i32_1 = arith.constant 0 : i32
    %c0_i32_2 = arith.constant 0 : i32
    return %arg0, %c0_i32, %c0_i32_0, %c0_i32_1 : i32, i32, i32, i32
  }
}

</mosaic_0001>

<bundles_post_ra>
// kernel: tpu_custom_call.1
= control target key start
LH: loop header
LB: loop body
LE: loop exit
PB: predicated region body
PF: predicated region fallthrough
CT: control target
= control target key end

     0   :  { %s5675_s0 = inlined_call_operand.vmem [shape: f32[3], index: 0, kind: input, shape index: {}]   ;;  %s5676_s1 = inlined_call_operand.vmem [shape: f32[2,4,16,16], index: 1, kind: input, shape index: {}]   ;;  %s5677_s2 = inlined_call_operand.vmem [shape: f32[224,16], index: 2, kind: input, shape index: {}]   ;;  %s5678_s3 = inlined_call_operand.vmem [shape: f32[224,16], index: 3, kind: input, shape index: {}]   ;;  %s5679_s4 = inlined_call_operand.vmem [shape: f32[224,16], index: 4, kind: input, shape index: {}]   ;;  %s5680_s5 = inlined_call_operand.hbm [shape: f32[2,4,16,16], index: 5, kind: output, shape index: {}]  }
   0x1   :  { %s10_s20 = sshll.u32 %s5675_s0, 4  ;;  %s11_s20 = int_to_ptr.vmem [resolvable:$true] %s10_s20 }
   0x2   :  { %s4836_s21 = scalar_lea.vmem %s11_s20, 16  ;;  %p4841_p1 = scmp.lt.s32.totalorder %s11_s20, %s11_s20 }
   0x3   :  { %p4837_p0 = scmp.ne.s32.totalorder %s11_s20, %s4836_s21  ;;  %p4842_p2 = scmp.lt.s32.totalorder %s4836_s21, %s4836_s21 }
   0x5   :  { %p4843_p3 = por %p4842_p2, %p4841_p1 }
   0x7   :  { %p4844_p4 = pnand %p4843_p3, %p4837_p0 }
   0x9   :  { %4847 = shalt.err (!%p4844_p4)  }
   0xa   :  { %s4914_s22 = smov [#allocation9]  }
   0xb   :  { %13 = dma.vmem_to_smem %s11_s20, 16, %s4914_s22, [#allocation8] }
   0xc   :  { %4892 = dma.done.wait [#allocation8], 16 }
   0xd   :  { %4893 = vsyncadd [#allocation8], 4294967280 }
   0xe   :  { %15 = sfence }
   0xf   :  { %16 = vsyncpa [#allocation11], 0 }
  0x10   :  { %18 = vsyncpa [#allocation11 + $0x1], 0  ;;  %s4955_s23 = smov 0   ;;  %s4957_s24 = smov 0  }
  0x11   :  { %s4959_s0 = smov 0   ;;  %s4961_s25 = smov 0  }
  0x12 LB: > { %s4976_s26 = sadd.s32 4294967295, %s4912_s25   ;;  %s4090_s27 = sadd.s32 4294967294, %s4912_s25   ;;  %s4912_s25 = sphi %s4961_s25, %s5686_s25   ;;  %s4908_s0 = sphi %s4959_s0, %s5685_s0   ;;  %s4904_s24 = sphi %s4957_s24, %s5684_s24   ;;  %s4900_s23 = sphi %s4955_s23, %s5683_s23  }
  0x13   : > { %s4980_s28 = sadd.s32 1, %s4912_s25   ;;  %s120_s29 = sadd.s32 1, %s4908_s0 }
  0x14   : > { %s117_s30 = ssub.s32 %s4912_s25, %s4980_s28  ;;  %p130_p5 = scmp.ne.s32.totalorder %s4908_s0, %s4904_s24 }
  0x15   : > { %p118_p6 = scmp.eq.s32.totalorder %s117_s30, 0  ;;  %p131_p7 = scmp.eq.s32.totalorder %s4976_s26, 1 }
  0x16   : > { %p136_p8 = scmp.ne.s32.totalorder %s4904_s24, %s4900_s23  ;;  %p137_p9 = scmp.eq.s32.totalorder %s4090_s27, 1 }
  0x17   : > { %s4991_s6 = scalar_select %p118_p6, %s4908_s0, %s120_s29  }
  0x18   : > { %p4993_p10 = por %p131_p7, %p130_p5  ;;  %p4997_p11 = por %p137_p9, %p136_p8 }
  0x19   : > { %p4093_p12 = scmp.ge.s32.totalorder %s4912_s25, 1  ;;  %p172_p13 = scmp.lt.s32.totalorder %s4912_s25, 3 }
  0x1b   : > { %p173_p0 = pnand %p4093_p12, %p172_p13 }
  0x1c   : > { %p198_p1 = scmp.lt.s32.totalorder (!%p173_p0), %s4976_s26, 1  ;;  %v259_v0 = vld [vmem:[%s5677_s2 + $0x10] sm:$0xff] (!%p173_p0)  ;;  %v260_v1 = vld [vmem:[%s5677_s2 + $0x18] sm:$0xff] (!%p173_p0)  ;;  %vm244_vm0 = vcmask (!%p173_p0), 124928   ;;  %v255_v3 = vld [vmem:[%s5677_s2] sm:$0xff] (!%p173_p0)  ;;  %v4915_v6 = vmov (!%p173_p0), 0.0  }
  0x1d   : > { %176 = sbr.rel (%p173_p0) target bundleno = 635 (0x27b), region = 36  ;;  %v4600_v2 = vpack.c.bf16 (!%p173_p0), %v260_v1, %v259_v0  ;;  %v256_v4 = vld [vmem:[%s5677_s2 + $0x8] sm:$0xff] (!%p173_p0)  ;;  %245 = vst.msk [vmem:[#allocation2 + $0x5] sm:$0x7] (!%p173_p0), %vm244_vm0, %v4915_v6  ;;  %246 = vst.msk [vmem:[#allocation2 + $0x18] sm:$0x7] (!%p173_p0), %vm244_vm0, %v4915_v6 }
  0x1e   : > { %v5017_v5 = vpack.c.bf16 (!%p173_p0), %v256_v4, %v255_v3  ;;  %249 = vst.msk [vmem:[#allocation3 + $0x5] sm:$0x7] (!%p173_p0), %vm244_vm0, %v4915_v6  ;;  %250 = vst.msk [vmem:[#allocation3 + $0x18] sm:$0x7] (!%p173_p0), %vm244_vm0, %v4915_v6  ;;  %v425_v7 = vld [vmem:[%s5677_s2 + $0x20] sm:$0xff] (!%p173_p0)  ;;  %v4916_v8 = vmov (!%p173_p0), 0.0|0.0  }
  0x1f   : > { %4601 = vmatprep.subr.bf16.mxu0 (!%p173_p0), %v4600_v2  ;;  %1544 = vst.msk [vmem:[#allocation4 + $0x5] sm:$0x7] (!%p173_p0), %vm244_vm0, %v4915_v6  ;;  %1545 = vst.msk [vmem:[#allocation4 + $0xc] sm:$0x7] (!%p173_p0), %vm244_vm0, %v4915_v6  ;;  %4656 = vmatprep.subr.bf16.mxu1 (!%p173_p0), %v4916_v8  ;;  %vm211_vm1 = vcmask (!%p173_p0), 130048   ;;  %v426_v9 = vld [vmem:[%s5677_s2 + $0x28] sm:$0xff] (!%p173_p0) }
  0x20   : > { %1559 = vst.msk [vmem:[#allocation5 + $0x5] sm:$0x7] (!%p173_p0), %vm244_vm0, %v4915_v6  ;;  %1560 = vst.msk [vmem:[#allocation5 + $0xc] sm:$0x7] (!%p173_p0), %vm244_vm0, %v4915_v6  ;;  %4603 = vmatpush3.bf16.msra.mxu0 (!%p173_p0), %v4600_v2  ;;  %v1574_v10 = vld [vmem:[%s5678_s3 + $0x10] sm:$0xff] (!%p173_p0)  ;;  %v1575_v11 = vld [vmem:[%s5678_s3 + $0x18] sm:$0xff] (!%p173_p0)  ;;  %v5073_v22 = vpack.c.bf16 (!%p173_p0), %v426_v9, %v425_v7 }
  0x21   : > { %2695 = vst.msk [vmem:[#allocation6 + $0x5] sm:$0x7] (!%p173_p0), %vm244_vm0, %v4915_v6  ;;  %2696 = vst.msk [vmem:[#allocation6 + $0xc] sm:$0x7] (!%p173_p0), %vm244_vm0, %v4915_v6  ;;  %vm4917_vm2 = vmmov (!%p173_p0), 0   ;;  %4605 = vmatprep.subr.bf16.mxu0 (!%p173_p0), %v5017_v5  ;;  %v4657_v12 = vpack.c.bf16 (!%p173_p0), %v1575_v11, %v1574_v10  ;;  %vm1550_vm3 = vcmask (!%p173_p0), 1041409  }
  0x22   : > { %2750 = vst.msk [vmem:[#allocation7 + $0x5] sm:$0x7] (!%p173_p0), %vm244_vm0, %v4915_v6  ;;  %2751 = vst.msk [vmem:[#allocation7 + $0xc] sm:$0x7] (!%p173_p0), %vm244_vm0, %v4915_v6  ;;  %4408 = vmatprep.mubr.msk.f32.mxu1 (!%p173_p0), %vm4917_vm2, %v4915_v6  ;;  %vm1552_vm4 = vcmask (!%p173_p0), 1042434   ;;  %vm1554_vm5 = vcmask (!%p173_p0), 1043459  }
  0x23   : > { %4658 = vmatpush3.bf16.msra.mxu1 (!%p173_p0), %v4657_v12  ;;  %vm1557_vm6 = vcmask (!%p173_p0), 125952   ;;  %vm2716_vm7 = vcmask (!%p173_p0), 130112   ;;  %s4127_s21 = sld [smem:[#allocation9 + $0x1]] (!%p173_p0)  ;;  %s243_s22 = sld [smem:[#allocation9]] (!%p173_p0) }
  0x24   : > { %s199_s17 = scalar_select %p198_p1, %s4976_s26, 1  ;;  %4659 = vmatprep.subr.bf16.mxu1 %v4916_v8 }
  0x25   : > { %s4143_s27 = sld [smem:[#allocation9 + $0x2]]  ;;  %s195_s29 = sand.u32 1, %s4904_s24  }
  0x26   : > { %s4164_s20 = sshll.u32 %s199_s17, 6  ;;  %s4094_s30 = sshll.u32 %s195_s29, 6 }
  0x27   : > { %s5061_s12 = scalar_lea.vmem %s5676_s1, %s4164_s20  ;;  %s5595_s9 = scalar_lea.vmem [#allocation10], %s4094_s30 }
  0x28   : > { %v205_v13 = vld [vmem:[%s5061_s12 + $0x10] sm:$0xff]  ;;  %v203_v14 = vld [vmem:[%s5061_s12] sm:$0xff]  ;;  %v206_v15 = vld [vmem:[%s5061_s12 + $0x18] sm:$0xff]  ;;  %s4165_s10 = sshll.u32 %s4976_s26, 10  ;;  %s4028_s11 = sshll.u32 %s5595_s9, 4  ;;  %s5628_s11 = int_to_ptr.vmem [resolvable:$true] %s4028_s11 }
  0x29   : > { %v213_v16 = vsel %vm211_vm1, %v205_v13, -inf  ;;  %v212_v17 = vsel %vm211_vm1, %v203_v14, -inf  ;;  %v220_v18 = vsel %vm211_vm1, %v206_v15, -inf  ;;  %v204_v19 = vld [vmem:[%s5061_s12 + $0x8] sm:$0xff]  ;;  %v207_v21 = vld [vmem:[%s5061_s12 + $0x20] sm:$0xff]  ;;  %v5079_v27 = vld [vmem:[%s5061_s12 + $0x38] sm:$0xff]  ;;  %s5626_s15 = scalar_lea.hbm %s5680_s5, %s4165_s10 }
  0x2a   : > { %v208_v20 = vld [vmem:[%s5061_s12 + $0x28] sm:$0xff]  ;;  %2658 = vmax.xlane.f32.xlu1 %v213_v16  ;;  %2654 = vmax.xlane.f32.xlu0 %v212_v17  ;;  %v1489_v23 = vmax.f32 %v213_v16, %v220_v18  ;;  %v219_v24 = vsel %vm211_vm1, %v204_v19, -inf  ;;  %v214_v26 = vsel %vm211_vm1, %v207_v21, -inf  ;;  %v5082_v28 = vld [vmem:[%s5061_s12 + $0x30] sm:$0xff]  ;;  %v223_v34 = vsel %vm211_vm1, %v5079_v27, -inf  ;;  %s5634_s26 = scalar_lea.sflag [#allocation11], %s195_s29 }
  0x2b   : > { %v221_v25 = vsel %vm211_vm1, %v208_v20, -inf  ;;  %v1482_v29 = vmax.f32 %v212_v17, %v219_v24  ;;  %v215_v32 = vmax.f32 %v212_v17, %v214_v26  ;;  %v216_v35 = vsel %vm211_vm1, %v5082_v28, -inf  ;;  %s4848_s16 = scalar_lea.vmem %s5628_s11, 1024 }
  0x2c   : > { %v222_v30 = vmax.f32 %v219_v24, %v221_v25  ;;  %v1496_v31 = vmax.f32 %v214_v26, %v221_v25  ;;  %v1490_v33 = vrot.slane %v1489_v23, 4  ;;  %v5090_v36 = vsel %vm211_vm1, %v204_v19, 0.0  ;;  %p4849_p2 = scmp.ne.s32.totalorder %s5628_s11, %s4848_s16 }
  0x2d   : > { %v1483_v37 = vrot.slane %v1482_v29, 4  ;;  %v224_v39 = vmax.f32 %v220_v18, %v223_v34  ;;  %v217_v40 = vmax.f32 %v213_v16, %v216_v35  ;;  %v1503_v42 = vmax.f32 %v216_v35, %v223_v34 }
  0x2e   : > { %v1497_v38 = vrot.slane %v1496_v31, 4  ;;  %2660 = vmax.xlane.f32.xlu1 %v220_v18  ;;  %v1491_v41 = vmax.f32 %v1489_v23, %v1490_v33  ;;  %2656 = vmax.xlane.f32.xlu0 %v219_v24  ;;  %v5093_v43 = vsel %vm211_vm1, %v203_v14, 0.0  ;;  %v5096_v44 = vsel %vm211_vm1, %v206_v15, 0.0  ;;  %p4850_p3 = pnand %p4849_p2, %p4993_p10 }
  0x2f   : > { %v1484_v45 = vmax.f32 %v1482_v29, %v1483_v37  ;;  %v225_v47 = vmax.f32 %v222_v30, %v224_v39  ;;  %v218_v48 = vmax.f32 %v215_v32, %v217_v40  ;;  %v1504_v50 = vrot.slane %v1503_v42, 4 }
  0x30   : > { %v1498_v46 = vmax.f32 %v1496_v31, %v1497_v38  ;;  %v1492_v49 = vrot.slane %v1491_v41, 2  ;;  %v1510_v51 = vadd.f32 %v5090_v36, %v5093_v43  ;;  %v235_v52 = vadd.f32 %v5096_v44, %v5090_v36  ;;  %p4851_p4 = pneg %p4850_p3 }
  0x31   : > { %v1485_v53 = vrot.slane %v1484_v45, 2  ;;  %248 = vst.msk [vmem:[#allocation2 + $0x10] sm:$0xff] %vm211_vm1, %v225_v47  ;;  %247 = vst.msk [vmem:[#allocation2 + $0x8] sm:$0xff] %vm211_vm1, %v218_v48  ;;  %v5105_v55 = vsel %vm211_vm1, %v205_v13, 0.0  ;;  %v5108_v56 = vsel %vm211_vm1, %v208_v20, 0.0  ;;  %v1505_v58 = vmax.f32 %v1503_v42, %v1504_v50 }
  0x32   : > { %v1499_v54 = vrot.slane %v1498_v46, 2  ;;  %v1493_v57 = vmax.f32 %v1491_v41, %v1492_v49  ;;  %2664 = vmax.xlane.f32.xlu1 %v221_v25  ;;  %2662 = vmax.xlane.f32.xlu0 %v214_v26  ;;  %v1511_v59 = vrot.slane %v1510_v51, 4  ;;  %v228_v60 = vadd.f32 %v5105_v55, %v5093_v43 }
  0x33   : > { %v1486_v61 = vmax.f32 %v1484_v45, %v1485_v53  ;;  %v1517_v63 = vadd.f32 %v5096_v44, %v5105_v55  ;;  %v237_v0 = vadd.f32 %v5108_v56, %v235_v52  ;;  %v1506_v2 = vrot.slane %v1505_v58, 2  ;;  %v512_v45 = vld [vmem:[%s5677_s2 + $0x30] sm:$0xff]  ;;  %v1572_v52 = vld [vmem:[%s5678_s3 + $0x8] sm:$0xff] }
  0x34   : > { %v1500_v62 = vmax.f32 %v1498_v46, %v1499_v54  ;;  %v1494_v1 = vrot.slane %v1493_v57, 1  ;;  %v1512_v3 = vadd.f32 %v1511_v59, %v1510_v51  ;;  %v5116_v4 = vsel %vm211_vm1, %v207_v21, 0.0  ;;  %v513_v46 = vld [vmem:[%s5677_s2 + $0x38] sm:$0xff]  ;;  %v1571_v51 = vld [vmem:[%s5678_s3] sm:$0xff] }
  0x35   : > { %v1487_v7 = vrot.slane %v1486_v61, 1  ;;  %v1518_v10 = vrot.slane %v1517_v63, 4  ;;  %v230_v11 = vadd.f32 %v5116_v4, %v228_v60  ;;  %v1507_v13 = vmax.f32 %v1505_v58, %v1506_v2 }
  0x36   : > { %v1501_v9 = vrot.slane %v1500_v62, 1  ;;  %v1495_v12 = vmax.f32 %v1493_v57, %v1494_v1  ;;  %2668 = vmax.xlane.f32.xlu1 %v223_v34  ;;  %2666 = vmax.xlane.f32.xlu0 %v216_v35  ;;  %v1513_v14 = vrot.slane %v1512_v3, 2  ;;  %v1524_v15 = vadd.f32 %v5108_v56, %v5116_v4 }
  0x37   : > { %v1488_v16 = vmax.f32 %v1486_v61, %v1487_v7  ;;  %v1519_v18 = vadd.f32 %v1518_v10, %v1517_v63  ;;  %v5123_v19 = vsel %vm211_vm1, %v5079_v27, 0.0  ;;  %v1508_v20 = vrot.slane %v1507_v13, 1  ;;  %v1724_v63 = vld [vmem:[%s5678_s3 + $0x28] sm:$0xff] }
  0x38   : > { %v1502_v17 = vmax.f32 %v1500_v62, %v1501_v9  ;;  %v257_v21 = vld [vmem:[#allocation2 + $0x6] sm:$0xff]  ;;  %v258_v23 = vld [vmem:[#allocation2 + $0xe] sm:$0xff]  ;;  %v1514_v24 = vadd.f32 %v1513_v14, %v1512_v3  ;;  %v1525_v25 = vrot.slane %v1524_v15, 4  ;;  %v239_v26 = vadd.f32 %v5123_v19, %v237_v0 }
  0x39   : > { %v1551_v29 = vsel %vm1550_vm3, %v1495_v12, %v1488_v16  ;;  %4310 = vmatprep.mubr.msk.f32.mxu0 %vm211_vm1, %v257_v21  ;;  %v1520_v30 = vrot.slane %v1519_v18, 2  ;;  %v253_v31 = vld [vmem:[#allocation2 + $0x5] sm:$0xff]  ;;  %v5130_v32 = vsel %vm211_vm1, %v5082_v28, 0.0  ;;  %v1509_v33 = vmax.f32 %v1507_v13, %v1508_v20  ;;  %v254_v49 = vld [vmem:[#allocation2 + $0xd] sm:$0xff]  ;;  %v1801_v12 = vld [vmem:[%s5678_s3 + $0x38] sm:$0xff] }
  0x3a   : > { %v1553_v27 = vsel %vm1552_vm4, %v1502_v17, %v1551_v29  ;;  %4311 = vmatmul.mubr.msk.f32.vlgmr.msra.gmra.mrb[0].mxu0 %vm211_vm1, %v258_v23  ;;  %2672 = vadd.xlane.f32.xlu1 %v5090_v36  ;;  %v1515_v34 = vrot.slane %v1514_v24, 1  ;;  %v1526_v35 = vadd.f32 %v1525_v25, %v1524_v15  ;;  %v242_v38 = vmul.f32 0.25, %v239_v26  ;;  %v423_v59 = vld [vmem:[#allocation2 + $0x7] sm:$0xff]  ;;  %v424_v10 = vld [vmem:[#allocation2 + $0xf] sm:$0xff] }
  0x3b   : > { %2670 = vadd.xlane.f32.xlu0 %v5093_v43  ;;  %4607 = vmatpush3.bf16.msra.mxu0 %v5017_v5  ;;  %v1521_v37 = vadd.f32 %v1520_v30, %v1519_v18  ;;  %v232_v39 = vadd.f32 %v5130_v32, %v230_v11  ;;  %v1531_v28 = vadd.f32 %v5123_v19, %v5130_v32  ;;  %v1723_v62 = vld [vmem:[%s5678_s3 + $0x20] sm:$0xff]  ;;  %v600_v3 = vld [vmem:[%s5677_s2 + $0x48] sm:$0xff]  ;;  %v1800_v11 = vld [vmem:[%s5678_s3 + $0x30] sm:$0xff] }
  0x3c   : > { %v1555_v40 = vsel %vm1554_vm5, %v1509_v33, %v1553_v27  ;;  %4317 = vmatprep.mubr.msk.f32.mxu0 %vm211_vm1, %v253_v31  ;;  %v1527_v41 = vrot.slane %v1526_v35, 2  ;;  %4609 = vmatprep.subr.bf16.mxu0 %v5073_v22  ;;  %v1516_v36 = vadd.f32 %v1515_v34, %v1514_v24  ;;  %252 = vst.msk [vmem:[#allocation3 + $0x10] sm:$0xff] %vm211_vm1, %v242_v38  ;;  %v510_v14 = vld [vmem:[#allocation2 + $0x8] sm:$0xff]  ;;  %v1877_v20 = vld [vmem:[%s5678_s3 + $0x40] sm:$0xff]  ;;  %v686_v23 = vld [vmem:[%s5677_s2 + $0x50] sm:$0xff] }
  0x3d   : > { %1558 = vst.msk [vmem:[#allocation4 + $0x8] sm:$0xf] %vm1557_vm6, %v1555_v40  ;;  %v1522_v42 = vrot.slane %v1521_v37, 1  ;;  %v241_v5 = vmul.f32 0.25, %v232_v39  ;;  %v1532_v43 = vrot.slane %v1531_v28, 4  ;;  %v4612_v54 = vpack.c.bf16 %v513_v46, %v512_v45  ;;  %v1878_v21 = vld [vmem:[%s5678_s3 + $0x48] sm:$0xff] }
  0x3e   : > { %2676 = vadd.xlane.f32.xlu1 %v5096_v44  ;;  %v1528_v47 = vadd.f32 %v1527_v41, %v1526_v35  ;;  %v1539_v57 = vmul.f32 0.0625, %v1516_v36  ;;  %v4660_v60 = vpack.c.bf16 %v1572_v52, %v1571_v51  ;;  %v4663_v7 = vpack.c.bf16 %v1724_v63, %v1723_v62  ;;  %v687_v24 = vld [vmem:[%s5677_s2 + $0x58] sm:$0xff]  ;;  %v511_v29 = vld [vmem:[#allocation2 + $0x10] sm:$0xff]  ;;  %v2031_v35 = vld [vmem:[%s5678_s3 + $0x60] sm:$0xff] }
  0x3f   : > { %v1523_v48 = vadd.f32 %v1522_v42, %v1521_v37  ;;  %2674 = vadd.xlane.f32.xlu0 %v5105_v55  ;;  %251 = vst.msk [vmem:[#allocation3 + $0x8] sm:$0xff] %vm211_vm1, %v241_v5  ;;  %v1533_v50 = vadd.f32 %v1532_v43, %v1531_v28  ;;  %v4666_v18 = vpack.c.bf16 %v1801_v12, %v1800_v11  ;;  %v1954_v30 = vld [vmem:[%s5678_s3 + $0x50] sm:$0xff]  ;;  %v1955_v31 = vld [vmem:[%s5678_s3 + $0x58] sm:$0xff]  ;;  %v2032_v37 = vld [vmem:[%s5678_s3 + $0x68] sm:$0xff] }
  0x40   : > { %v1529_v53 = vrot.slane %v1528_v47, 1  ;;  %v4669_v26 = vpack.c.bf16 %v1878_v21, %v1877_v20  ;;  %v4620_v27 = vpack.c.bf16 %v687_v24, %v686_v23  ;;  %v4672_v34 = vpack.c.bf16 %v1955_v31, %v1954_v30  ;;  %v773_v38 = vld [vmem:[%s5677_s2 + $0x60] sm:$0xff]  ;;  %v774_v39 = vld [vmem:[%s5677_s2 + $0x68] sm:$0xff]  ;;  %v598_v41 = vld [vmem:[#allocation2 + $0x11] sm:$0xff] }
  0x41   : > { %v1540_v44 = vmul.f32 0.0625, %v1523_v48  ;;  %v1534_v58 = vrot.slane %v1533_v50, 2  ;;  %v4675_v40 = vpack.c.bf16 %v2032_v37, %v2031_v35  ;;  %v2108_v36 = vld [vmem:[%s5678_s3 + $0x70] sm:$0xff]  ;;  %v2109_v42 = vld [vmem:[%s5678_s3 + $0x78] sm:$0xff]  ;;  %v4624_v43 = vpack.c.bf16 %v774_v39, %v773_v38  ;;  %v2186_v48 = vld [vmem:[%s5678_s3 + $0x88] sm:$0xff] }
  0x42   : > { %4318 = vmatmul.mubr.msk.f32.vlgmr.msra.gmra.mrb[0].mxu0 %vm211_vm1, %v254_v49  ;;  %2680 = vadd.xlane.f32.xlu1 %v5108_v56  ;;  %v1530_v55 = vadd.f32 %v1529_v53, %v1528_v47  ;;  %v684_v5 = vld [vmem:[#allocation2 + $0xa] sm:$0xff]  ;;  %v4678_v46 = vpack.c.bf16 %v2109_v42, %v2108_v36  ;;  %v2185_v47 = vld [vmem:[%s5678_s3 + $0x80] sm:$0xff]  ;;  %v685_v53 = vld [vmem:[#allocation2 + $0x12] sm:$0xff] }
  0x43   : > { %2678 = vadd.xlane.f32.xlu0 %v5116_v4  ;;  %4611 = vmatpush3.bf16.msra.mxu0 %v5073_v22  ;;  %v1535_v61 = vadd.f32 %v1534_v58, %v1533_v50  ;;  %v1565_v1 = vsel %vm1550_vm3, %v1540_v44, %v1539_v57  ;;  %v599_v22 = vld [vmem:[%s5677_s2 + $0x40] sm:$0xff]  ;;  %v860_v49 = vld [vmem:[%s5677_s2 + $0x70] sm:$0xff]  ;;  %v861_v50 = vld [vmem:[%s5677_s2 + $0x78] sm:$0xff]  ;;  %v4681_v52 = vpack.c.bf16 %v2186_v48, %v2185_v47 }
  0x44   : > { %v1541_v0 = vmul.f32 0.0625, %v1530_v55  ;;  %4324 = vmatprep.mubr.msk.f32.mxu0 %vm211_vm1, %v423_v59  ;;  %4613 = vmatprep.subr.bf16.mxu0 %v4612_v54  ;;  %v1573_v56 = vld [vmem:[#allocation4 + $0x6] sm:$0xf]  ;;  %v4616_v15 = vpack.c.bf16 %v600_v3, %v599_v22  ;;  %v1953_v28 = vld [vmem:[#allocation4 + $0xa] sm:$0xf]  ;;  %v2263_v57 = vld [vmem:[%s5678_s3 + $0x98] sm:$0xff]  ;;  %v4628_v58 = vpack.c.bf16 %v861_v50, %v860_v49 }
  0x45   : > { %v1536_v2 = vrot.slane %v1535_v61, 1  ;;  %4409 = vmatmul.mubr.msk.f32.vlgmr.msra.gmra.mrb[0].mxu1 %vm211_vm1, %v1573_v56  ;;  %v1570_v4 = vld [vmem:[#allocation4 + $0x5] sm:$0xf]  ;;  %v1876_v33 = vld [vmem:[#allocation4 + $0x9] sm:$0xf]  ;;  %v2417_v22 = vld [vmem:[%s5678_s3 + $0xb8] sm:$0xff] }
  0x46   : > { %2684 = vadd.xlane.f32.xlu1 %v5123_v19  ;;  %4661 = vmatpush3.bf16.msra.mxu1 %v4660_v60  ;;  %v1566_v13 = vsel %vm1552_vm4, %v1541_v0, %v1565_v1  ;;  %v1722_v17 = vld [vmem:[#allocation4 + $0x7] sm:$0xf]  ;;  %v2030_v45 = vld [vmem:[#allocation4 + $0xb] sm:$0xf]  ;;  %v772_v1 = vld [vmem:[#allocation2 + $0x13] sm:$0xff] }
  0x47   : > { %v1537_v9 = vadd.f32 %v1536_v2, %v1535_v61  ;;  %2682 = vadd.xlane.f32.xlu0 %v5130_v32  ;;  %4415 = vmatprep.mubr.msk.f32.mxu1 %vm4917_vm2, %v4915_v6  ;;  %v1799_v25 = vld [vmem:[#allocation4 + $0x8] sm:$0xf]  ;;  %v2339_v60 = vld [vmem:[%s5678_s3 + $0xa0] sm:$0xff]  ;;  %v2416_v2 = vld [vmem:[%s5678_s3 + $0xb0] sm:$0xff] }
  0x48   : > { %4662 = vmatprep.subr.bf16.mxu1 %v4916_v8  ;;  %v597_v32 = vld [vmem:[#allocation2 + $0x9] sm:$0xff]  ;;  %v947_v62 = vld [vmem:[%s5677_s2 + $0x80] sm:$0xff]  ;;  %v1209_v35 = vld [vmem:[%s5677_s2 + $0xb8] sm:$0xff] }
  0x49   : > { %v1542_v16 = vmul.f32 0.0625, %v1537_v9  ;;  %4416 = vmatmul.mubr.msk.f32.vlgmr.msra.gmra.mrb[2].mxu1 %vm211_vm1, %v1570_v4  ;;  %v771_v44 = vld [vmem:[#allocation2 + $0xb] sm:$0xff]  ;;  %v4690_v9 = vpack.c.bf16 %v2417_v22, %v2416_v2  ;;  %v2802_v24 = vld [vmem:[%s5679_s4] sm:$0xff] }
  0x4a   : > { %4325 = vmatmul.mubr.msk.f32.vlgmr.msra.gmra.mrb[0].mxu0 %vm211_vm1, %v424_v10  ;;  %4664 = vmatpush3.bf16.msra.mxu1 %v4663_v7  ;;  %v2340_v61 = vld [vmem:[%s5678_s3 + $0xa8] sm:$0xff]  ;;  %v2493_v10 = vld [vmem:[%s5678_s3 + $0xc0] sm:$0xff]  ;;  %v1034_v12 = vld [vmem:[%s5677_s2 + $0x90] sm:$0xff] }
  0x4b   : > { %v1567_v19 = vsel %vm1554_vm5, %v1542_v16, %v1566_v13  ;;  %4615 = vmatpush3.bf16.msra.mxu0 %v4612_v54  ;;  %4331 = vmatprep.mubr.msk.f32.mxu0 %vm211_vm1, %v510_v14  ;;  %v2262_v54 = vld [vmem:[%s5678_s3 + $0x90] sm:$0xff]  ;;  %v948_v63 = vld [vmem:[%s5677_s2 + $0x88] sm:$0xff]  ;;  %v4687_v56 = vpack.c.bf16 %v2340_v61, %v2339_v60  ;;  %v1035_v13 = vld [vmem:[%s5677_s2 + $0x98] sm:$0xff] }
  0x4c   : > { %1569 = vst.msk [vmem:[#allocation5 + $0x8] sm:$0xf] %vm1557_vm6, %v1567_v19  ;;  %4617 = vmatprep.subr.bf16.mxu0 %v4616_v15  ;;  %4422 = vmatprep.mubr.msk.f32.mxu1 %vm4917_vm2, %v4915_v6  ;;  %v4684_v55 = vpack.c.bf16 %v2263_v57, %v2262_v54  ;;  %v858_v3 = vld [vmem:[#allocation3 + $0x5] sm:$0xff]  ;;  %v4632_v4 = vpack.c.bf16 %v948_v63, %v947_v62  ;;  %v859_v16 = vld [vmem:[#allocation3 + $0xd] sm:$0xff]  ;;  %v2705_v54 = vlaneseq }
  0x4d   : > { %4423 = vmatmul.mubr.msk.f32.vlgmr.msra.gmra.mrb[4].mxu1 %vm211_vm1, %v1722_v17  ;;  %4665 = vmatprep.subr.bf16.mxu1 %v4916_v8  ;;  %v2494_v11 = vld [vmem:[%s5678_s3 + $0xc8] sm:$0xff]  ;;  %v2570_v17 = vld [vmem:[%s5678_s3 + $0xd0] sm:$0xff]  ;;  %v4636_v20 = vpack.c.bf16 %v1035_v13, %v1034_v12 }
  0x4e   : > { %4667 = vmatpush3.bf16.msra.mxu1 %v4666_v18  ;;  %4429 = vmatprep.mubr.msk.f32.mxu1 %vm4917_vm2, %v4915_v6  ;;  %v2571_v18 = vld [vmem:[%s5678_s3 + $0xd8] sm:$0xff]  ;;  %v945_v19 = vld [vmem:[#allocation3 + $0x6] sm:$0xff]  ;;  %v1033_v37 = vld [vmem:[#allocation3 + $0xf] sm:$0xff]  ;;  %v2706_v57 = vand.u32 127, %v2705_v54 }
  0x4f   : > { %4668 = vmatprep.subr.bf16.mxu1 %v4916_v8  ;;  %v4696_v23 = vpack.c.bf16 %v2571_v18, %v2570_v17  ;;  %v1119_v38 = vld [vmem:[#allocation3 + $0x8] sm:$0xff]  ;;  %v1294_v48 = vld [vmem:[#allocation3 + $0x12] sm:$0xff] }
  0x50   : > { %v1206_v36 = vld [vmem:[#allocation3 + $0x9] sm:$0xff] }
  0x51   : > { %4430 = vmatmul.mubr.msk.f32.vlgmr.msra.gmra.mrb[6].mxu1 %vm211_vm1, %v1799_v25  ;;  %v2803_v25 = vld [vmem:[%s5679_s4 + $0x8] sm:$0xff]  ;;  %v2805_v50 = vld [vmem:[%s5679_s4 + $0x10] sm:$0xff] }
  0x52   : > { %4332 = vmatmul.mubr.msk.f32.vlgmr.msra.gmra.mrb[0].mxu0 %vm211_vm1, %v511_v29  ;;  %4670 = vmatpush3.bf16.msra.mxu1 %v4669_v26  ;;  %v1121_v26 = vld [vmem:[%s5677_s2 + $0xa0] sm:$0xff]  ;;  %v1122_v29 = vld [vmem:[%s5677_s2 + $0xa8] sm:$0xff]  ;;  %v4702_v31 = vpack.c.bf16 %v2803_v25, %v2802_v24  ;;  %v3031_v25 = vld [vmem:[%s5679_s4 + $0x30] sm:$0xff] }
  0x53   : > { %4619 = vmatpush3.bf16.msra.mxu0 %v4616_v15  ;;  %4338 = vmatprep.mubr.msk.f32.mxu0 %vm211_vm1, %v597_v32  ;;  %v2107_v51 = vld [vmem:[#allocation5 + $0x5] sm:$0xf]  ;;  %v2415_v14 = vld [vmem:[#allocation5 + $0x9] sm:$0xf]  ;;  %v4693_v15 = vpack.c.bf16 %v2494_v11, %v2493_v10  ;;  %v946_v32 = vld [vmem:[#allocation3 + $0xe] sm:$0xff] }
  0x54   : > { %4621 = vmatprep.subr.bf16.mxu0 %v4620_v27  ;;  %4436 = vmatprep.mubr.msk.f32.mxu1 %vm4917_vm2, %v4915_v6  ;;  %v2184_v59 = vld [vmem:[#allocation5 + $0x6] sm:$0xf]  ;;  %v2492_v21 = vld [vmem:[#allocation5 + $0xa] sm:$0xf]  ;;  %v1380_v49 = vld [vmem:[#allocation3 + $0xb] sm:$0xff] }
  0x55   : > { %4437 = vmatmul.mubr.msk.f32.vlgmr.msra.gmra.mrb[8].mxu1 %vm211_vm1, %v1876_v33  ;;  %4671 = vmatprep.subr.bf16.mxu1 %v4916_v8  ;;  %v2261_v0 = vld [vmem:[#allocation5 + $0x7] sm:$0xf]  ;;  %v2569_v30 = vld [vmem:[#allocation5 + $0xb] sm:$0xf]  ;;  %v4640_v33 = vpack.c.bf16 %v1122_v29, %v1121_v26  ;;  %v2955_v24 = vld [vmem:[%s5679_s4 + $0x28] sm:$0xff] }
  0x56   : > { %4673 = vmatpush3.bf16.msra.mxu1 %v4672_v34  ;;  %4443 = vmatprep.mubr.msk.f32.mxu1 %vm4917_vm2, %v4915_v6  ;;  %v2338_v7 = vld [vmem:[#allocation5 + $0x8] sm:$0xf]  ;;  %v1208_v34 = vld [vmem:[%s5677_s2 + $0xb0] sm:$0xff]  ;;  %v3032_v26 = vld [vmem:[%s5679_s4 + $0x38] sm:$0xff] }
  0x57   : > { %4674 = vmatprep.subr.bf16.mxu1 %v4916_v8  ;;  %v4644_v39 = vpack.c.bf16 %v1209_v35, %v1208_v34  ;;  %v3108_v34 = vld [vmem:[%s5679_s4 + $0x40] sm:$0xff]  ;;  %v3109_v35 = vld [vmem:[%s5679_s4 + $0x48] sm:$0xff] }
  0x59   : > { %4444 = vmatmul.mubr.msk.f32.vlgmr.msra.gmra.mrb[10].mxu1 %vm211_vm1, %v1953_v28  ;;  %v1295_v28 = vld [vmem:[%s5677_s2 + $0xc0] sm:$0xff] }
  0x5a   : > { %4339 = vmatmul.mubr.msk.f32.vlgmr.msra.gmra.mrb[0].mxu0 %vm211_vm1, %v598_v41  ;;  %4676 = vmatpush3.bf16.msra.mxu1 %v4675_v40  ;;  %v1296_v40 = vld [vmem:[%s5677_s2 + $0xc8] sm:$0xff]  ;;  %v1120_v41 = vld [vmem:[#allocation3 + $0x10] sm:$0xff] }
  0x5b   : > { %4623 = vmatpush3.bf16.msra.mxu0 %v4620_v27  ;;  %4345 = vmatprep.mubr.msk.f32.mxu0 %vm211_vm1, %v684_v5  ;;  %v1032_v27 = vld [vmem:[#allocation3 + $0x7] sm:$0xff]  ;;  %v4648_v42 = vpack.c.bf16 %v1296_v40, %v1295_v28  ;;  %v1382_v5 = vld [vmem:[%s5677_s2 + $0xd0] sm:$0xff] }
  0x5c   : > { %4625 = vmatprep.subr.bf16.mxu0 %v4624_v43  ;;  %4450 = vmatprep.mubr.msk.f32.mxu1 %vm4917_vm2, %v4915_v6 }
  0x5d   : > { %4451 = vmatmul.mubr.msk.f32.vlgmr.msra.gmra.mrb[12].mxu1 %vm211_vm1, %v2030_v45  ;;  %4677 = vmatprep.subr.bf16.mxu1 %v4916_v8  ;;  %v1207_v45 = vld [vmem:[#allocation3 + $0x11] sm:$0xff] }
  0x5e   : > { %4679 = vmatpush3.bf16.msra.mxu1 %v4678_v46  ;;  %4457 = vmatprep.mubr.msk.f32.mxu1 %vm4917_vm2, %v4915_v6  ;;  %v1293_v46 = vld [vmem:[#allocation3 + $0xa] sm:$0xff] }
  0x5f   : > { %4680 = vmatprep.subr.bf16.mxu1 %v4916_v8 }
  0x61   : > { %4458 = vmatmul.mubr.msk.f32.vlgmr.msra.gmra.mrb[14].mxu1 %vm211_vm1, %v2107_v51  ;;  %v2806_v51 = vld [vmem:[%s5679_s4 + $0x18] sm:$0xff] }
  0x62   : > { %4346 = vmatmul.mubr.msk.f32.vlgmr.msra.gmra.mrb[0].mxu0 %vm211_vm1, %v685_v53  ;;  %4682 = vmatpush3.bf16.msra.mxu1 %v4681_v52  ;;  %v1381_v52 = vld [vmem:[#allocation3 + $0x13] sm:$0xff]  ;;  %v4699_v53 = vpack.c.bf16 %v2806_v51, %v2805_v50  ;;  %v3262_v50 = vld [vmem:[%s5679_s4 + $0x60] sm:$0xff]  ;;  %v3263_v51 = vld [vmem:[%s5679_s4 + $0x68] sm:$0xff] }
  0x63   : > { %4627 = vmatpush3.bf16.msra.mxu0 %v4624_v43  ;;  %4352 = vmatprep.mubr.msk.f32.mxu0 %vm211_vm1, %v771_v44  ;;  %v1383_v43 = vld [vmem:[%s5677_s2 + $0xd8] sm:$0xff]  ;;  %v2711_v44 = vadd.s32 4294967288, %v2706_v57 }
  0x64   : > { %4629 = vmatprep.subr.bf16.mxu0 %v4628_v58  ;;  %4464 = vmatprep.mubr.msk.f32.mxu1 %vm4917_vm2, %v4915_v6  ;;  %v4652_v47 = vpack.c.bf16 %v1383_v43, %v1382_v5  ;;  %v4711_v43 = vpack.c.bf16 %v3109_v35, %v3108_v34  ;;  %v3801_v34 = vld [vmem:[%s5679_s4 + $0xd0] sm:$0xff]  ;;  %v3802_v35 = vld [vmem:[%s5679_s4 + $0xd8] sm:$0xff] }
  0x65   : > { %4465 = vmatmul.mubr.msk.f32.vlgmr.msra.gmra.mrb[16].mxu1 %vm211_vm1, %v2184_v59  ;;  %4683 = vmatprep.subr.bf16.mxu1 %v4916_v8 }
  0x66   : > { %4685 = vmatpush3.bf16.msra.mxu1 %v4684_v55  ;;  %4471 = vmatprep.mubr.msk.f32.mxu1 %vm4917_vm2, %v4915_v6  ;;  %v5398_v55 = vshrl.u32 %v2705_v54, 7 }
  0x67   : > { %4686 = vmatprep.subr.bf16.mxu1 %v4916_v8 }
  0x68   : > { %v5401_v60 = vsub.s32 %v2711_v44, %v5398_v55  ;;  %v5404_v63 = vsub.s32 %v2706_v57, %v5398_v55 }
  0x69   : > { %4472 = vmatmul.mubr.msk.f32.vlgmr.msra.gmra.mrb[18].mxu1 %vm211_vm1, %v2261_v0 }
  0x6a   : > { %4353 = vmatmul.mubr.msk.f32.vlgmr.msra.gmra.mrb[0].mxu0 %vm211_vm1, %v772_v1  ;;  %4688 = vmatpush3.bf16.msra.mxu1 %v4687_v56 }
  0x6b   : > { %4631 = vmatpush3.bf16.msra.mxu0 %v4628_v58  ;;  %4359 = vmatprep.mubr.msk.f32.mxu0 %vm211_vm1, %v858_v3 }
  0x6c   : > { %4633 = vmatprep.subr.bf16.mxu0 %v4632_v4  ;;  %4478 = vmatprep.mubr.msk.f32.mxu1 %vm4917_vm2, %v4915_v6 }
  0x6d   : > { %4479 = vmatmul.mubr.msk.f32.vlgmr.msra.gmra.mrb[20].mxu1 %vm211_vm1, %v2338_v7  ;;  %4689 = vmatprep.subr.bf16.mxu1 %v4916_v8 }
  0x6e   : > { %4691 = vmatpush3.bf16.msra.mxu1 %v4690_v9  ;;  %4485 = vmatprep.mubr.msk.f32.mxu1 %vm4917_vm2, %v4915_v6 }
  0x6f   : > { %4692 = vmatprep.subr.bf16.mxu1 %v4916_v8 }
  0x71   : > { %4486 = vmatmul.mubr.msk.f32.vlgmr.msra.gmra.mrb[22].mxu1 %vm211_vm1, %v2415_v14 }
  0x72   : > { %4360 = vmatmul.mubr.msk.f32.vlgmr.msra.gmra.mrb[0].mxu0 %vm211_vm1, %v859_v16  ;;  %4694 = vmatpush3.bf16.msra.mxu1 %v4693_v15 }
  0x73   : > { %4635 = vmatpush3.bf16.msra.mxu0 %v4632_v4  ;;  %4366 = vmatprep.mubr.msk.f32.mxu0 %vm211_vm1, %v945_v19 }
  0x74   : > { %4637 = vmatprep.subr.bf16.mxu0 %v4636_v20  ;;  %4492 = vmatprep.mubr.msk.f32.mxu1 %vm4917_vm2, %v4915_v6 }
  0x75   : > { %4493 = vmatmul.mubr.msk.f32.vlgmr.msra.gmra.mrb[24].mxu1 %vm211_vm1, %v2492_v21  ;;  %4695 = vmatprep.subr.bf16.mxu1 %v4916_v8 }
  0x76   : > { %4697 = vmatpush3.bf16.msra.mxu1 %v4696_v23  ;;  %4499 = vmatprep.mubr.msk.f32.mxu1 %vm4917_vm2, %v4915_v6  ;;  %v2954_v23 = vld [vmem:[%s5679_s4 + $0x20] sm:$0xff] }
  0x77   : > { %4701 = vmatprep.subr.bf16.mxu1 %v4916_v8 }
  0x79   : > { %4500 = vmatmul.mubr.msk.f32.vlgmr.msra.gmra.mrb[26].mxu1 %vm211_vm1, %v2569_v30 }
  0x7a   : > { %4367 = vmatmul.mubr.msk.f32.vlgmr.msra.gmra.mrb[0].mxu0 %vm211_vm1, %v946_v32  ;;  %4703 = vmatpush3.bf16.msra.mxu1 %v4702_v31 }
  0x7b   : > { %4639 = vmatpush3.bf16.msra.mxu0 %v4636_v20  ;;  %4373 = vmatprep.mubr.msk.f32.mxu0 %vm211_vm1, %v1032_v27  ;;  %v4705_v27 = vpack.c.bf16 %v2955_v24, %v2954_v23 }
  0x7c   : > { %4641 = vmatprep.subr.bf16.mxu0 %v4640_v33  ;;  %4513 = vmatprep.mubr.msk.f32.mxu1 %vm4917_vm2, %v4915_v6 }
  0x7d   : > { %4707 = vmatprep.subr.bf16.mxu1 %v4916_v8 }
  0x82   : > { %4374 = vmatmul.mubr.msk.f32.vlgmr.msra.gmra.mrb[0].mxu0 %vm211_vm1, %v1033_v37  ;;  %v3185_v37 = vld [vmem:[%s5679_s4 + $0x50] sm:$0xff] }
  0x83   : > { %4643 = vmatpush3.bf16.msra.mxu0 %v4640_v33  ;;  %4380 = vmatprep.mubr.msk.f32.mxu0 %vm211_vm1, %v1119_v38  ;;  %v4708_v33 = vpack.c.bf16 %v3032_v26, %v3031_v25  ;;  %v3186_v38 = vld [vmem:[%s5679_s4 + $0x58] sm:$0xff]  ;;  %v3647_v25 = vld [vmem:[%s5679_s4 + $0xb0] sm:$0xff] }
  0x84   : > { %4645 = vmatprep.subr.bf16.mxu0 %v4644_v39  ;;  %v3648_v26 = vld [vmem:[%s5679_s4 + $0xb8] sm:$0xff] }
  0x8a   : > { %4381 = vmatmul.mubr.msk.f32.vlgmr.msra.gmra.mrb[0].mxu0 %vm211_vm1, %v1120_v41 }
  0x8b   : > { %4647 = vmatpush3.bf16.msra.mxu0 %v4644_v39  ;;  %4387 = vmatprep.mubr.msk.f32.mxu0 %vm211_vm1, %v1206_v36 }
  0x8c   : > { %4649 = vmatprep.subr.bf16.mxu0 %v4648_v42 }
  0x92   : > { %4388 = vmatmul.mubr.msk.f32.vlgmr.msra.gmra.mrb[0].mxu0 %vm211_vm1, %v1207_v45 }
  0x93   : > { %4651 = vmatpush3.bf16.msra.mxu0 %v4648_v42  ;;  %4394 = vmatprep.mubr.msk.f32.mxu0 %vm211_vm1, %v1293_v46 }
  0x94   : > { %4653 = vmatprep.subr.bf16.mxu0 %v4652_v47 }
  0x9a   : > { %4395 = vmatmul.mubr.msk.f32.vlgmr.msra.gmra.mrb[0].mxu0 %vm211_vm1, %v1294_v48  ;;  %v4714_v48 = vpack.c.bf16 %v3186_v38, %v3185_v37 }
  0x9b   : > { %4655 = vmatpush3.bf16.msra.mxu0 %v4652_v47  ;;  %4401 = vmatprep.mubr.msk.f32.mxu0 %vm211_vm1, %v1380_v49 }
  0x9c   : > { %4698 = vmatprep.subr.bf16.mxu0 %v4916_v8 }
  0xa2   : > { %4402 = vmatmul.mubr.msk.f32.vlgmr.msra.gmra.mrb[0].mxu0 %vm211_vm1, %v1381_v52  ;;  %v3339_v52 = vld [vmem:[%s5679_s4 + $0x70] sm:$0xff] }
  0xa3   : > { %4700 = vmatpush3.bf16.msra.mxu0 %v4699_v53  ;;  %4506 = vmatprep.mubr.msk.f32.mxu0 %vm4917_vm2, %v4915_v6 }
  0xa4   : > { %4704 = vmatprep.subr.bf16.mxu0 %v4916_v8 }
  0xb7   : > { %v2659_v58 = vpop.xlane.xlu1 %2658  ;;  %v2655_v59 = vpop.xlane.xlu0 %2654 }
  0xb8   : > { %v2721_v22 = vrot.slane %v2659_v58, %v5404_v63  ;;  %v2710_v3 = vrot.slane %v2655_v59, %v5404_v63 }
  0xbb   : > { %v2661_v61 = vpop.xlane.xlu1 %2660  ;;  %v2657_v62 = vpop.xlane.xlu0 %2656 }
  0xbc   : > { %v2725_v0 = vrot.slane %v2661_v61, %v5401_v60  ;;  %v2715_v56 = vrot.slane %v2657_v62, %v5401_v60  ;;  %v3340_v61 = vld [vmem:[%s5679_s4 + $0x78] sm:$0xff] }
  0xbe   : > { %v2726_v9 = vsel %vm2716_vm7, %v2725_v0, %v2721_v22  ;;  %v2717_v10 = vsel %vm2716_vm7, %v2715_v56, %v2710_v3 }
  0xbf   : > { %v2665_v1 = vpop.xlane.xlu1 %2664  ;;  %v2663_v2 = vpop.xlane.xlu0 %2662  ;;  %v2745_v16 = vsel %vm1550_vm3, %v2726_v9, %v2717_v10  ;;  %v3417_v9 = vld [vmem:[%s5679_s4 + $0x88] sm:$0xff] }
  0xc0   : > { %v2734_v4 = vrot.slane %v2665_v1, %v5401_v60  ;;  %v2730_v7 = vrot.slane %v2663_v2, %v5404_v63  ;;  %v4717_v2 = vpack.c.bf16 %v3263_v51, %v3262_v50 }
  0xc2   : > { %v2735_v11 = vsel %vm2716_vm7, %v2734_v4, %v2730_v7  ;;  %v4720_v4 = vpack.c.bf16 %v3340_v61, %v3339_v52  ;;  %v3416_v7 = vld [vmem:[%s5679_s4 + $0x80] sm:$0xff] }
  0xc3   : > { %v2669_v12 = vpop.xlane.xlu1 %2668  ;;  %v2667_v13 = vpop.xlane.xlu0 %2666  ;;  %v2746_v17 = vsel %vm1552_vm4, %v2735_v11, %v2745_v16 }
  0xc4   : > { %v2743_v14 = vrot.slane %v2669_v12, %v5401_v60  ;;  %v2739_v15 = vrot.slane %v2667_v13, %v5404_v63 }
  0xc6   : > { %v2744_v18 = vsel %vm2716_vm7, %v2743_v14, %v2739_v15 }
  0xc7   : > { %v2747_v19 = vsel %vm1554_vm5, %v2744_v18, %v2746_v17  ;;  %v2673_v20 = vpop.xlane.xlu1 %2672  ;;  %v3493_v18 = vld [vmem:[%s5679_s4 + $0x90] sm:$0xff] }
  0xc8   : > { %2749 = vst.msk [vmem:[#allocation6 + $0x8] sm:$0xf] %vm1557_vm6, %v2747_v19  ;;  %v2671_v21 = vpop.xlane.xlu0 %2670  ;;  %v2687_v39 = vmul.f32 0.0625, %v2673_v20  ;;  %v3494_v19 = vld [vmem:[%s5679_s4 + $0x98] sm:$0xff]  ;;  %v3570_v20 = vld [vmem:[%s5679_s4 + $0xa0] sm:$0xff] }
  0xc9   : > { %v2686_v28 = vmul.f32 0.0625, %v2671_v21  ;;  %v3571_v21 = vld [vmem:[%s5679_s4 + $0xa8] sm:$0xff]  ;;  %v4726_v23 = vpack.c.bf16 %v3494_v19, %v3493_v18  ;;  %v2646_v18 = vstv %s4127_s21 }
  0xca   : > { %v2767_v53 = vrot.slane %v2687_v39, %v5401_v60  ;;  %v4729_v24 = vpack.c.bf16 %v3571_v21, %v3570_v20  ;;  %v4738_v39 = vpack.c.bf16 %v3802_v35, %v3801_v34 }
  0xcb   : > { %v2677_v29 = vpop.xlane.xlu1 %2676  ;;  %v2763_v54 = vrot.slane %v2686_v28, %v5404_v63 }
  0xcc   : > { %v2675_v30 = vpop.xlane.xlu0 %2674  ;;  %v2689_v31 = vmul.f32 0.0625, %v2677_v29  ;;  %v3724_v29 = vld [vmem:[%s5679_s4 + $0xc0] sm:$0xff] }
  0xcd   : > { %v2688_v32 = vmul.f32 0.0625, %v2675_v30  ;;  %v2768_v10 = vsel %vm2716_vm7, %v2767_v53, %v2763_v54  ;;  %v3725_v30 = vld [vmem:[%s5679_s4 + $0xc8] sm:$0xff] }
  0xce   : > { %v2776_v45 = vrot.slane %v2689_v31, %v5401_v60 }
  0xcf   : > { %v2681_v40 = vpop.xlane.xlu1 %2680  ;;  %v2804_v41 = vld [vmem:[#allocation6 + $0x6] sm:$0xf]  ;;  %v2772_v46 = vrot.slane %v2688_v32, %v5404_v63  ;;  %v3184_v12 = vld [vmem:[#allocation6 + $0xa] sm:$0xf] }
  0xd0   : > { %v2801_v36 = vld [vmem:[#allocation6 + $0x5] sm:$0xf]  ;;  %v2691_v42 = vmul.f32 0.0625, %v2681_v40  ;;  %v2679_v5 = vpop.xlane.xlu0 %2678  ;;  %4507 = vmatmul.mubr.msk.f32.vlgmr.msra.gmra.mrb[2].mxu0 %vm211_vm1, %v2804_v41  ;;  %v3261_v17 = vld [vmem:[#allocation6 + $0xb] sm:$0xf] }
  0xd1   : > { %4514 = vmatmul.mubr.msk.f32.vlgmr.msra.gmra.mrb[28].mxu1 %vm211_vm1, %v2801_v36  ;;  %v2690_v47 = vmul.f32 0.0625, %v2679_v5  ;;  %4706 = vmatpush3.bf16.msra.mxu0 %v4705_v27  ;;  %v2953_v58 = vld [vmem:[#allocation6 + $0x7] sm:$0xf]  ;;  %v2777_v56 = vsel %vm2716_vm7, %v2776_v45, %v2772_v46  ;;  %v4732_v27 = vpack.c.bf16 %v3648_v26, %v3647_v25  ;;  %v1467_v26 = vstv %s243_s22 }
  0xd2   : > { %4709 = vmatpush3.bf16.msra.mxu1 %v4708_v33  ;;  %v2785_v49 = vrot.slane %v2691_v42, %v5401_v60  ;;  %4520 = vmatprep.mubr.msk.f32.mxu0 %vm4917_vm2, %v4915_v6  ;;  %v3030_v59 = vld [vmem:[#allocation6 + $0x8] sm:$0xf]  ;;  %v2796_v13 = vsel %vm1550_vm3, %v2777_v56, %v2768_v10  ;;  %v4735_v33 = vpack.c.bf16 %v3725_v30, %v3724_v29 }
  0xd3   : > { %4527 = vmatprep.mubr.msk.f32.mxu1 %vm4917_vm2, %v4915_v6  ;;  %v2781_v57 = vrot.slane %v2690_v47, %v5404_v63  ;;  %v2685_v44 = vpop.xlane.xlu1 %2684  ;;  %4710 = vmatprep.subr.bf16.mxu0 %v4916_v8 }
  0xd4   : > { %4713 = vmatprep.subr.bf16.mxu1 %v4916_v8  ;;  %v2693_v62 = vmul.f32 0.0625, %v2685_v44  ;;  %v2683_v0 = vpop.xlane.xlu0 %2682  ;;  %4521 = vmatmul.mubr.msk.f32.vlgmr.msra.gmra.mrb[4].mxu0 %vm211_vm1, %v2953_v58 }
  0xd5   : > { %4528 = vmatmul.mubr.msk.f32.vlgmr.msra.gmra.mrb[30].mxu1 %vm211_vm1, %v3030_v59  ;;  %v2692_v1 = vmul.f32 0.0625, %v2683_v0  ;;  %4712 = vmatpush3.bf16.msra.mxu0 %v4711_v43  ;;  %v2786_v22 = vsel %vm2716_vm7, %v2785_v49, %v2781_v57 }
  0xd6   : > { %4715 = vmatpush3.bf16.msra.mxu1 %v4714_v48  ;;  %v2794_v3 = vrot.slane %v2693_v62, %v5401_v60  ;;  %4534 = vmatprep.mubr.msk.f32.mxu0 %vm4917_vm2, %v4915_v6  ;;  %v3107_v60 = vld [vmem:[#allocation6 + $0x9] sm:$0xf]  ;;  %v2797_v14 = vsel %vm1552_vm4, %v2786_v22, %v2796_v13 }
  0xd7   : > { %4541 = vmatprep.mubr.msk.f32.mxu1 %vm4917_vm2, %v4915_v6  ;;  %v2790_v11 = vrot.slane %v2692_v1, %v5404_v63  ;;  %4716 = vmatprep.subr.bf16.mxu0 %v4916_v8  ;;  %v4723_v63 = vpack.c.bf16 %v3417_v9, %v3416_v7 }
  0xd8   : > { %4719 = vmatprep.subr.bf16.mxu1 %v4916_v8  ;;  %4535 = vmatmul.mubr.msk.f32.vlgmr.msra.gmra.mrb[6].mxu0 %vm211_vm1, %v3107_v60 }
  0xd9   : > { %4542 = vmatmul.mubr.msk.f32.vlgmr.msra.gmra.mrb[32].mxu1 %vm211_vm1, %v3184_v12  ;;  %v2795_v15 = vsel %vm2716_vm7, %v2794_v3, %v2790_v11  ;;  %4718 = vmatpush3.bf16.msra.mxu0 %v4717_v2 }
  0xda   : > { %4548 = vmatprep.mubr.msk.f32.mxu0 %vm4917_vm2, %v4915_v6  ;;  %v2798_v16 = vsel %vm1554_vm5, %v2795_v15, %v2797_v14  ;;  %4721 = vmatpush3.bf16.msra.mxu1 %v4720_v4 }
  0xdb   : > { %4722 = vmatprep.subr.bf16.mxu0 %v4916_v8  ;;  %2800 = vst.msk [vmem:[#allocation7 + $0x8] sm:$0xf] %vm1557_vm6, %v2798_v16  ;;  %4555 = vmatprep.mubr.msk.f32.mxu1 %vm4917_vm2, %v4915_v6 }
  0xdc   : > { %4725 = vmatprep.subr.bf16.mxu1 %v4916_v8  ;;  %4549 = vmatmul.mubr.msk.f32.vlgmr.msra.gmra.mrb[8].mxu0 %vm211_vm1, %v3261_v17 }
  0xdd   : > { %4724 = vmatpush3.bf16.msra.mxu0 %v4723_v63  ;;  %4562 = vmatprep.mubr.msk.f32.mxu0 %vm4917_vm2, %v4915_v6 }
  0xde   : > { %4728 = vmatprep.subr.bf16.mxu0 %v4916_v8 }
  0xe2   : > { %v3338_v31 = vld [vmem:[#allocation7 + $0x5] sm:$0xf]  ;;  %v3646_v28 = vld [vmem:[#allocation7 + $0x9] sm:$0xf] }
  0xe3   : > { %v3415_v32 = vld [vmem:[#allocation7 + $0x6] sm:$0xf]  ;;  %4556 = vmatmul.mubr.msk.f32.vlgmr.msra.gmra.mrb[34].mxu1 %vm211_vm1, %v3338_v31  ;;  %v3723_v40 = vld [vmem:[#allocation7 + $0xa] sm:$0xf] }
  0xe4   : > { %4563 = vmatmul.mubr.msk.f32.vlgmr.msra.gmra.mrb[10].mxu0 %vm211_vm1, %v3415_v32  ;;  %4727 = vmatpush3.bf16.msra.mxu1 %v4726_v23  ;;  %v3492_v37 = vld [vmem:[#allocation7 + $0x7] sm:$0xf]  ;;  %v3800_v41 = vld [vmem:[#allocation7 + $0xb] sm:$0xf] }
  0xe5   : > { %4730 = vmatpush3.bf16.msra.mxu0 %v4729_v24  ;;  %4569 = vmatprep.mubr.msk.f32.mxu1 %vm4917_vm2, %v4915_v6  ;;  %v3569_v38 = vld [vmem:[#allocation7 + $0x8] sm:$0xf]  ;;  %v4918_v24 = vmov 1966171168  }
  0xe6   : > { %4576 = vmatprep.mubr.msk.f32.mxu0 %vm4917_vm2, %v4915_v6  ;;  %4731 = vmatprep.subr.bf16.mxu1 %v4916_v8  ;;  %v3887_v25 = vunpack.c.l.s4 %v4918_v24 }
  0xe7   : > { %4734 = vmatprep.subr.bf16.mxu0 %v4916_v8  ;;  %4570 = vmatmul.mubr.msk.f32.vlgmr.msra.gmra.mrb[36].mxu1 %vm211_vm1, %v3492_v37 }
  0xe8   : > { %4577 = vmatmul.mubr.msk.f32.vlgmr.msra.gmra.mrb[12].mxu0 %vm211_vm1, %v3569_v38  ;;  %4733 = vmatpush3.bf16.msra.mxu1 %v4732_v27  ;;  %v3888_v32 = vunpack.c.0.s8 %v3887_v25 }
  0xe9   : > { %4736 = vmatpush3.bf16.msra.mxu0 %v4735_v33  ;;  %4583 = vmatprep.mubr.msk.f32.mxu1 %vm4917_vm2, %v4915_v6 }
  0xea   : > { %4590 = vmatprep.mubr.msk.f32.mxu0 %vm4917_vm2, %v4915_v6  ;;  %4737 = vmatprep.subr.bf16.mxu1 %v4916_v8  ;;  %v3891_v35 = vsub.s32 %v3888_v32, %v5398_v55 }
  0xeb   : > { %4584 = vmatmul.mubr.msk.f32.vlgmr.msra.gmra.mrb[38].mxu1 %vm211_vm1, %v3646_v28 }
  0xec   : > { %4591 = vmatmul.mubr.msk.f32.vlgmr.msra.gmra.mrb[14].mxu0 %vm211_vm1, %v3723_v40  ;;  %4739 = vmatpush3.bf16.msra.mxu1 %v4738_v39 }
  0xed   : > { %4597 = vmatprep.mubr.msk.f32.mxu1 %vm4917_vm2, %v4915_v6 }
  0xef   : > { %4598 = vmatmul.mubr.msk.f32.vlgmr.msra.gmra.mrb[40].mxu1 %vm211_vm1, %v3800_v41 }
 0x118   : > { %v1645_v36 = vpop.f32.mrb[0].mxu1 }
 0x119   : > { %v4410_v42 = vpop.f32.mrb[1].mxu1 }
 0x11c   : > { %v1718_v5 = vpop.f32.mrb[2].mxu1 }
 0x11d   : > { %v1719_v43 = vadd.f32 %v1718_v5, %v1645_v36  ;;  %v4417_v45 = vpop.f32.mrb[3].mxu1 }
 0x120   : > { %v1794_v46 = vpop.f32.mrb[4].mxu1 }
 0x121   : > { %v1798_v8 = vadd.f32 %v1794_v46, %v1719_v43  ;;  %v4424_v47 = vpop.f32.mrb[5].mxu1  ;;  %v5560_v43 = vsub.s32 0, %v5398_v55 }
 0x124   : > { %v1871_v48 = vpop.f32.mrb[6].mxu1 }
 0x125   : > { %v1875_v49 = vadd.f32 %v1871_v48, %v1798_v8  ;;  %v4431_v50 = vpop.f32.mrb[7].mxu1 }
 0x128   : > { %v1948_v51 = vpop.f32.mrb[8].mxu1 }
 0x129   : > { %v1952_v52 = vadd.f32 %v1948_v51, %v1875_v49  ;;  %v4438_v53 = vpop.f32.mrb[9].mxu1 }
 0x12c   : > { %v2025_v54 = vpop.f32.mrb[10].mxu1 }
 0x12d   : > { %v2029_v57 = vadd.f32 %v2025_v54, %v1952_v52  ;;  %v4445_v6 = vpop.f32.mrb[11].mxu1 }
 0x130   : > { %v2102_v44 = vpop.f32.mrb[12].mxu1 }
 0x131   : > { %v2106_v58 = vadd.f32 %v2102_v44, %v2029_v57  ;;  %v4452_v59 = vpop.f32.mrb[13].mxu1 }
 0x134   : > { %v2179_v61 = vpop.f32.mrb[14].mxu1 }
 0x135   : > { %v2183_v62 = vadd.f32 %v2179_v61, %v2106_v58  ;;  %v4459_v0 = vpop.f32.mrb[15].mxu1 }
 0x138   : > { %v2256_v56 = vpop.f32.mrb[16].mxu1 }
 0x139   : > { %v2260_v1 = vadd.f32 %v2256_v56, %v2183_v62  ;;  %v4466_v2 = vpop.f32.mrb[17].mxu1 }
 0x13c   : > { %v2333_v22 = vpop.f32.mrb[18].mxu1 }
 0x13d   : > { %v2337_v3 = vadd.f32 %v2333_v22, %v2260_v1  ;;  %v4473_v4 = vpop.f32.mrb[19].mxu1 }
 0x140   : > { %v2410_v7 = vpop.f32.mrb[20].mxu1 }
 0x141   : > { %v2414_v9 = vadd.f32 %v2410_v7, %v2337_v3  ;;  %v4480_v10 = vpop.f32.mrb[21].mxu1 }
 0x144   : > { %v2487_v11 = vpop.f32.mrb[22].mxu1 }
 0x145   : > { %v2491_v60 = vadd.f32 %v2487_v11, %v2414_v9  ;;  %v4487_v12 = vpop.f32.mrb[23].mxu1 }
 0x148   : > { %v2564_v13 = vpop.f32.mrb[24].mxu1 }
 0x149   : > { %v2568_v14 = vadd.f32 %v2564_v13, %v2491_v60  ;;  %v4494_v15 = vpop.f32.mrb[25].mxu1 }
 0x14c   : > { %v2641_v63 = vpop.f32.mrb[26].mxu1 }
 0x14d   : > { %v2645_v16 = vadd.f32 %v2641_v63, %v2568_v14  ;;  %v4501_v17 = vpop.f32.mrb[27].mxu1 }
 0x14f   : > { %v2647_v19 = vadd.f32 %v2646_v18, %v2645_v16 }
 0x151   : > { %v4142_v20 = vmul.f32 -1.442695, %v2647_v19 }
 0x153   : > { %4812 = vpow2.f32 %v4142_v20 }
 0x15d   : > { %v4813_v21 = vpop.eup %4812 }
 0x15e   : > { %v2651_v23 = vadd.f32 1.0, %v4813_v21 }
 0x160   : > { %4814 = vrcp.f32 %v2651_v23 }
 0x16a   : > { %v4815_v37 = vpop.eup %4814 }
 0x16b   : > { %v3892_v38 = vrot.slane %v4815_v37, %v3891_v35 }
 0x16d   : > { %v3893_v39 = vcombine.high %v3892_v38, %v3892_v38  ;;  %v3900_v42 = vrot.slane %v3892_v38, %v3891_v35 }
 0x16f   : > { %v3907_v5 = vrot.slane %v3893_v39, %v3891_v35  ;;  %v3908_v45 = vcombine.high %v3900_v42, %v3900_v42  ;;  %v3913_v8 = vrot.slane %v3900_v42, %v5560_v43  ;;  %v3877_v39 = vstv %s4143_s27 }
 0x171   : > { %v3909_v46 = vcombine.high %v3907_v5, %v3907_v5  ;;  %v3917_v47 = vrot.slane %v3907_v5, %v5560_v43  ;;  %v3921_v48 = vrot.slane %v3908_v45, %v5560_v43 }
 0x173   : > { %v3925_v49 = vrot.slane %v3909_v46, %v5560_v43 }
 0x175   : > { %v4403_v29 = vpop.f32.mrb[0].mxu0 }
 0x176   : > { %v1469_v30 = vadd.f32 %v4403_v29, %v1467_v26  ;;  %v1456_v31 = vpop.f32.mrb[1].mxu0 }
 0x177   : > { %v1468_v27 = vadd.f32 %v1467_v26, %v1456_v31 }
 0x178   : > { %v4126_v33 = vmul.f32 -1.442695, %v1469_v30 }
 0x179   : > { %v4125_v34 = vmul.f32 -1.442695, %v1468_v27 }
 0x17a   : > { %4816 = vpow2.f32 %v4126_v33 }
 0x17b   : > { %4818 = vpow2.f32 %v4125_v34 }
 0x184   : > { %v4817_v28 = vpop.eup %4816 }
 0x185   : > { %v4819_v40 = vpop.eup %4818  ;;  %v1477_v41 = vadd.f32 1.0, %v4817_v28 }
 0x186   : > { %v1476_v36 = vadd.f32 1.0, %v4819_v40 }
 0x187   : > { %4820 = vrcp.f32 %v1477_v41 }
 0x188   : > { %4822 = vrcp.f32 %v1476_v36 }
 0x191   : > { %v4821_v50 = vpop.eup %4820 }
 0x192   : > { %v4823_v51 = vpop.eup %4822  ;;  %v5566_v52 = vadd.f32 %v4821_v50, %v3913_v8  ;;  %v5568_v53 = vadd.f32 %v4821_v50, %v3917_v47  ;;  %v5570_v54 = vadd.f32 %v4821_v50, %v3921_v48  ;;  %v5572_v57 = vadd.f32 %v4821_v50, %v3925_v49 }
 0x193   : > { %v5574_v6 = vadd.f32 %v4823_v51, %v3913_v8  ;;  %v5576_v44 = vadd.f32 %v4823_v51, %v3917_v47  ;;  %v5578_v58 = vadd.f32 %v4823_v51, %v3921_v48  ;;  %v5580_v59 = vadd.f32 %v4823_v51, %v3925_v49 }
 0x194   : > { %v3951_v8 = vsub.s32 1, %v5398_v55  ;;  %v3962_v47 = vsub.s32 2, %v5398_v55  ;;  %v3973_v50 = vsub.s32 3, %v5398_v55  ;;  %v4828_v55 = vld [vmem:[%s5061_s12 + $0x8] sm:$0xff] }
 0x1a3   : > { %v2876_v61 = vpop.f32.mrb[2].mxu0 }
 0x1a4   : > { %v2949_v62 = vpop.f32.mrb[28].mxu1  ;;  %v4508_v56 = vpop.f32.mrb[3].mxu0 }
 0x1a5   : > { %v2950_v0 = vadd.f32 %v2949_v62, %v2876_v61  ;;  %v4515_v1 = vpop.f32.mrb[29].mxu1 }
 0x1a6   : > { %v4829_v1 = vld [vmem:[%s5061_s12] sm:$0xff] }
 0x1a7   : > { %v3025_v2 = vpop.f32.mrb[4].mxu0 }
 0x1a8   : > { %v3102_v22 = vpop.f32.mrb[30].mxu1  ;;  %v3029_v3 = vadd.f32 %v3025_v2, %v2950_v0  ;;  %v4522_v4 = vpop.f32.mrb[5].mxu0 }
 0x1a9   : > { %v4529_v7 = vpop.f32.mrb[31].mxu1 }
 0x1aa   : > { %v3106_v9 = vadd.f32 %v3102_v22, %v3029_v3 }
 0x1ab   : > { %v3179_v10 = vpop.f32.mrb[6].mxu0 }
 0x1ac   : > { %v3256_v11 = vpop.f32.mrb[32].mxu1  ;;  %v3183_v60 = vadd.f32 %v3179_v10, %v3106_v9  ;;  %v4536_v12 = vpop.f32.mrb[7].mxu0 }
 0x1ad   : > { %v4543_v13 = vpop.f32.mrb[33].mxu1 }
 0x1ae   : > { %v3260_v14 = vadd.f32 %v3256_v11, %v3183_v60  ;;  %v4831_v11 = vld [vmem:[%s5061_s12 + $0x20] sm:$0xff] }
 0x1af   : > { %v3333_v15 = vpop.f32.mrb[8].mxu0 }
 0x1b0   : > { %v3337_v63 = vadd.f32 %v3333_v15, %v3260_v14  ;;  %v4550_v16 = vpop.f32.mrb[9].mxu0 }
 0x1b6   : > { %v3410_v17 = vpop.f32.mrb[34].mxu1 }
 0x1b7   : > { %v3487_v18 = vpop.f32.mrb[10].mxu0  ;;  %v3414_v19 = vadd.f32 %v3410_v17, %v3337_v63  ;;  %v4557_v20 = vpop.f32.mrb[35].mxu1  ;;  %v4832_v63 = vld [vmem:[%s5061_s12 + $0x18] sm:$0xff]  ;;  %v4833_v17 = vld [vmem:[%s5061_s12 + $0x30] sm:$0xff] }
 0x1b8   : > { %v4564_v21 = vpop.f32.mrb[11].mxu0 }
 0x1b9   : > { %v3491_v23 = vadd.f32 %v3487_v18, %v3414_v19 }
 0x1ba   : > { %v3564_v24 = vpop.f32.mrb[36].mxu1 }
 0x1bb   : > { %v3641_v25 = vpop.f32.mrb[12].mxu0  ;;  %v3568_v26 = vadd.f32 %v3564_v24, %v3491_v23  ;;  %v4571_v29 = vpop.f32.mrb[37].mxu1 }
 0x1bc   : > { %v4578_v30 = vpop.f32.mrb[13].mxu0  ;;  %v4835_v29 = vld [vmem:[%s5061_s12 + $0x38] sm:$0xff] }
 0x1bd   : > { %v3645_v31 = vadd.f32 %v3641_v25, %v3568_v26 }
 0x1be   : > { %v3718_v32 = vpop.f32.mrb[38].mxu1 }
 0x1bf   : > { %v3795_v27 = vpop.f32.mrb[14].mxu0  ;;  %v3722_v33 = vadd.f32 %v3718_v32, %v3645_v31  ;;  %v4585_v34 = vpop.f32.mrb[39].mxu1 }
 0x1c0   : > { %v4592_v35 = vpop.f32.mrb[15].mxu0 }
 0x1c1   : > { %v3799_v37 = vadd.f32 %v3795_v27, %v3722_v33 }
 0x1c2   : > { %v3872_v38 = vpop.f32.mrb[40].mxu1 }
 0x1c3   : > { %v3876_v28 = vadd.f32 %v3872_v38, %v3799_v37  ;;  %v4599_v40 = vpop.f32.mrb[41].mxu1 }
 0x1c5   : > { %v3878_v41 = vadd.f32 %v3877_v39, %v3876_v28 }
 0x1c7   : > { %v4158_v36 = vmul.f32 -1.442695, %v3878_v41 }
 0x1c9   : > { %4824 = vpow2.f32 %v4158_v36 }
 0x1d3   : > { %v4825_v42 = vpop.eup %4824 }
 0x1d4   : > { %v3882_v5 = vadd.f32 1.0, %v4825_v42 }
 0x1d6   : > { %4826 = vrcp.f32 %v3882_v5 }
 0x1e0   : > { %v4827_v45 = vpop.eup %4826 }
 0x1e1   : > { %v3941_v46 = vrot.slane %v4827_v45, %v5560_v43  ;;  %v3952_v48 = vrot.slane %v4827_v45, %v3951_v8  ;;  %v3963_v49 = vrot.slane %v4827_v45, %v3962_v47  ;;  %v3974_v51 = vrot.slane %v4827_v45, %v3973_v50 }
 0x1e3   : > { %3947 = vbcast.lane.b32.xlu1 %v3941_v46, 264  ;;  %3943 = vbcast.lane.b32.xlu0 %v3941_v46, 256 }
 0x1e7   : > { %3954 = vbcast.lane.b32.xlu1 %v3952_v48, 256  ;;  %3965 = vbcast.lane.b32.xlu0 %v3963_v49, 256 }
 0x1eb   : > { %3958 = vbcast.lane.b32.xlu1 %v3952_v48, 264  ;;  %3976 = vbcast.lane.b32.xlu0 %v3974_v51, 256 }
 0x1ef   : > { %3969 = vbcast.lane.b32.xlu1 %v3963_v49, 264 }
 0x1f3   : > { %3980 = vbcast.lane.b32.xlu1 %v3974_v51, 264 }
 0x255   : > { %v3948_v43 = vpop.permute.xlu1 %3947  ;;  %v3944_v61 = vpop.permute.xlu0 %3943 }
 0x256   : > { %v3983_v62 = vadd.f32 %v3948_v43, %v5566_v52  ;;  %v3982_v0 = vadd.f32 %v3944_v61, %v5574_v6  ;;  %v4830_v52 = vld [vmem:[%s5061_s12 + $0x10] sm:$0xff] }
 0x258   : > { %v3991_v56 = vmul.f32 %v4828_v55, %v3983_v62  ;;  %v3990_v2 = vmul.f32 %v4829_v1, %v3982_v0 }
 0x259   : > { %v3955_v22 = vpop.permute.xlu1 %3954  ;;  %v3966_v3 = vpop.permute.xlu0 %3965 }
 0x25a   : > { %v3999_v4 = vmul.f32 0.33333334, %v3991_v56  ;;  %v3998_v7 = vmul.f32 0.33333334, %v3990_v2  ;;  %v3984_v9 = vadd.f32 %v3955_v22, %v5576_v44  ;;  %v3986_v10 = vadd.f32 %v3966_v3, %v5578_v58 }
 0x25c   : > { %4007 = vst.msk [vmem:[%s5595_s9 + $0x8] sm:$0xff] %vm211_vm1, %v3999_v4  ;;  %4006 = vst.msk [vmem:[%s5595_s9] sm:$0xff] %vm211_vm1, %v3998_v7  ;;  %v3992_v6 = vmul.f32 %v4830_v52, %v3984_v9  ;;  %v3994_v60 = vmul.f32 %v4831_v11, %v3986_v10 }
 0x25d   : > { %v3959_v12 = vpop.permute.xlu1 %3958  ;;  %v3977_v44 = vpop.permute.xlu0 %3976 }
 0x25e   : > { %v4000_v58 = vmul.f32 0.33333334, %v3992_v6  ;;  %v4002_v13 = vmul.f32 0.33333334, %v3994_v60  ;;  %v3985_v14 = vadd.f32 %v3959_v12, %v5568_v53  ;;  %v3988_v15 = vadd.f32 %v3977_v44, %v5580_v59  ;;  %v4834_v53 = vld [vmem:[%s5061_s12 + $0x28] sm:$0xff]  ;;  %s4919_s12 = smov [#allocation10]  }
 0x25f   : > { %s4852_s17 = sshll.u32 %s4919_s12, 4  ;;  %s4853_s17 = int_to_ptr.vmem [resolvable:$false] %s4852_s17 }
 0x260   : > { %4008 = vst.msk [vmem:[%s5595_s9 + $0x10] sm:$0xff] %vm211_vm1, %v4000_v58  ;;  %4010 = vst.msk [vmem:[%s5595_s9 + $0x20] sm:$0xff] %vm211_vm1, %v4002_v13  ;;  %v3993_v16 = vmul.f32 %v4832_v63, %v3985_v14  ;;  %v3996_v18 = vmul.f32 %v4833_v17, %v3988_v15  ;;  %s4854_s18 = scalar_lea.vmem %s4853_s17, 2048  ;;  %p4855_p5 = scmp.lt.s32.totalorder %s5628_s11, %s4853_s17 }
 0x261   : > { %v3970_v19 = vpop.permute.xlu1 %3969  ;;  %p4856_p6 = scmp.lt.s32.totalorder %s4854_s18, %s4848_s16 }
 0x262   : > { %v4001_v20 = vmul.f32 0.33333334, %v3993_v16  ;;  %v4004_v21 = vmul.f32 0.33333334, %v3996_v18  ;;  %v3987_v23 = vadd.f32 %v3970_v19, %v5570_v54 }
 0x263   : > { %p4857_p7 = por %p4856_p6, %p4855_p5 }
 0x264   : > { %4009 = vst.msk [vmem:[%s5595_s9 + $0x18] sm:$0xff] %vm211_vm1, %v4001_v20  ;;  %4012 = vst.msk [vmem:[%s5595_s9 + $0x30] sm:$0xff] %vm211_vm1, %v4004_v21  ;;  %v3995_v59 = vmul.f32 %v4834_v53, %v3987_v23 }
 0x265   : > { %v3981_v24 = vpop.permute.xlu1 %3980  ;;  %p4858_p8 = pnand %p4857_p7, %p4851_p4 }
 0x266   : > { %v4003_v25 = vmul.f32 0.33333334, %v3995_v59  ;;  %v3989_v26 = vadd.f32 %v3981_v24, %v5572_v57 }
 0x268   : > { %4011 = vst.msk [vmem:[%s5595_s9 + $0x28] sm:$0xff] %vm211_vm1, %v4003_v25  ;;  %v3997_v30 = vmul.f32 %v4835_v29, %v3989_v26 }
 0x26a   : > { %v4005_v54 = vmul.f32 0.33333334, %v3997_v30 }
 0x26c   : > { %4013 = vst.msk [vmem:[%s5595_s9 + $0x38] sm:$0xff] %vm211_vm1, %v4005_v54 }
 0x26d   : > { %4861 = shalt.err (!%p4858_p8)
}
 0x26e   : > { %s4862_s19 = scalar_lea.hbm %s5626_s15, 1024  ;;  %s4866_s22 = scalar_lea.hbm %s5680_s5, 2048 }
 0x26f   : > { %p4863_p9 = scmp.ne.s32.totalorder %s5626_s15, %s4862_s19  ;;  %p4867_p0 = scmp.lt.u32.totalorder %s5626_s15, %s5680_s5 }
 0x270   : > { %p4868_p1 = scmp.lt.u32.totalorder %s4866_s22, %s4862_s19  ;;  %p4870_p3 = scmp.lt.u32.totalorder %s4862_s19, %s5626_s15 }
 0x271   : > { %p4864_p12 = pnand %p4863_p9, %p4993_p10 }
 0x272   : > { %p4869_p2 = por %p4868_p1, %p4867_p0 }
 0x273   : > { %p4865_p13 = pneg %p4864_p12 }
 0x274   : > { %p4871_p4 = por %p4870_p3, %p4869_p2 }
 0x276   : > { %p4872_p5 = pnand %p4871_p4, %p4865_p13 }
 0x278   : > { %4875 = shalt.err (!%p4872_p5)
}
 0x279   : > { %s4920_s30 = smov 128   ;;  %s4921_s9 = smov 8  }
 0x27a   : > { %4766 = dma.vmem_to_hbm [thread:$0]  (%p4993_p10), %s5628_s11, 1024, %s5626_s15, %s5634_s26, %s4920_s30, %s4920_s30, %s4921_s9  }
 0x27b PF: > { %p4772_p6 = scmp.ge.s32.totalorder %s4912_s25, 2  ;;  %s4043_s10 = sand.u32 1, %s4900_s23  }
 0x27c   : > { %s4044_s13 = scalar_lea.sflag [#allocation11], %s4043_s10 }
 0x27d   : > { %p4769_p7 = pnand %p4772_p6, %p4997_p11 }
 0x27f   : > { %4895 = dma.done.wait (!%p4769_p7), %s4044_s13, 1024  }
 0x280   : > { %4897 = vsyncadd (!%p4769_p7), %s4044_s13, 4294966272  ;;  %p21_p8 = scmp.ge.s32.totalorder %s4980_s28, 4   ;;  %s5683_s23 = smov %s4904_s24 }
 0x281   : > { %s5684_s24 = smov %s4908_s0  ;;  %s5685_s0 = smov %s4991_s6 }
 0x282   : > { %s5686_s25 = smov %s4980_s28  ;;  %23 = sbr.rel (!%p21_p8) target bundleno = 18 (0x12), region = 71 }
 0x289   :  { %4049 = vsyncpa [#allocation11], 1 }
 0x28a   :  { %4051 = vsyncpa [#allocation11 + $0x1], 1 }

</bundles_post_ra>
